<compile_context>
chip_gen: v7x
topology: tpu7x:2x2x1
jax: 0.10.0
libtpu: 0.0.40
codegen_flags: <defaults>
</compile_context>

<pallas_src>
import jax
import jax.numpy as jnp
import numpy as np
from jax.experimental import pallas as pl
from jax.experimental.pallas import tpu as pltpu


# ----------------------------------------------------------------------------
# Block-size helpers (blocks always divide the array or equal its full extent,
# so every BlockSpec satisfies the (8/16, 128)-or-full-dim rule).
# ----------------------------------------------------------------------------
def _pick_block(n, preferred, multiple):
    """Largest block <= preferred that divides n and is a multiple of
    `multiple`; falls back to the full extent n (always legal)."""
    if n <= preferred:
        return n
    start = preferred - (preferred % multiple)
    for cand in range(start, 0, -multiple):
        if n % cand == 0:
            return cand
    return n


def _pick_divisor(n, preferred):
    """Largest divisor of n <= preferred (used for leading block dims that
    carry no (8,128) constraint)."""
    if n <= preferred:
        return n
    for cand in range(preferred, 0, -1):
        if n % cand == 0:
            return cand
    return n


def _vmem_limit(need_bytes):
    # generous headroom, but never below the common 32 MiB scoped default and
    # never an absurd request (v7x physical VMEM is 64 MiB).
    return int(min(100 * 1024 * 1024, max(32 * 1024 * 1024, 2 * need_bytes)))


# ----------------------------------------------------------------------------
# Kernel 1: input projection, hoisted out of the serial scan.
#   gi[m, :] = x[m, :] @ W_ih + b_ih      (one big MXU matmul over B*T rows)
# ----------------------------------------------------------------------------
def _input_proj_kernel(x_ref, wih_ref, bih_ref, gi_ref):
    acc = jnp.dot(x_ref[...], wih_ref[...], preferred_element_type=jnp.float32)
    gi_ref[...] = (acc + bih_ref[...]).astype(gi_ref.dtype)


# ----------------------------------------------------------------------------
# Kernel 2: sequential GRU scan.
#   grid = (batch blocks ["parallel"], time blocks ["arbitrary"])
#   per grid step: tt timesteps statically unrolled, h carried in f32 VMEM.
# ----------------------------------------------------------------------------
def _gru_scan_kernel(gi_ref, h0_ref, whh_ref, out_ref, hT_ref, h_sc):
    t = pl.program_id(1)
    H = h0_ref.shape[1]
    TT = gi_ref.shape[0]

    @pl.when(t == 0)
    def _():
        h_sc[...] = h0_ref[...].astype(jnp.float32)

    w_hh = whh_ref[...]            # (H, 3H) bf16, VMEM-resident across the grid
    h = h_sc[...]                  # (bb, H) f32 carried hidden state

    # Statically unrolled in-block scan (TT is a compile-time block size); all
    # per-step ref accesses are leading-axis static indices.
    for i in range(TT):
        gi = gi_ref[i].astype(jnp.float32)                      # (bb, 3H)
        # Recurrent matmul (bf16 in, f32 accumulate).  For small bb on the
        # 256-wide v6e/v7x MXUs this is M-starved; explicit RHS residency via
        # pltpu.matmul_push_rhs/acc_lhs/pop is the next lever if profiling
        # shows the weight re-push dominating.
        gh = jnp.dot(h.astype(w_hh.dtype), w_hh,
                     preferred_element_type=jnp.float32)        # (bb, 3H)
        r = jax.nn.sigmoid(gi[:, :H] + gh[:, :H])
        z = jax.nn.sigmoid(gi[:, H:2 * H] + gh[:, H:2 * H])
        n = jnp.tanh(gi[:, 2 * H:] + r * gh[:, 2 * H:])
        h = n + z * (h - n)                      # == (1-z)*n + z*h, one op fewer
        out_ref[i] = h.astype(out_ref.dtype)     # bf16 per-step hidden state

    h_sc[...] = h                                # carry to next time block

    @pl.when(t == pl.num_programs(1) - 1)
    def _():
        hT_ref[...] = h.astype(hT_ref.dtype)     # final state written once


# ----------------------------------------------------------------------------
# Wrapper: AbstractGRU.forward(x, hx=None, max_length=None) -> (output, hx)
#   output: (B, T, H) bfloat16   (per perf review; halves the dominant write)
#   hx    : (B, H)    float32
# ----------------------------------------------------------------------------
def abstract_gru_forward(params, x, hx=None, max_length=None, *,
                         block_t=16, block_b=128, block_m=512):
    B, T_in, D = x.shape
    H = params["w_hh"].shape[0]
    T = T_in if max_length is None else max_length
    if T > T_in:
        raise ValueError(f"max_length={T} exceeds sequence length {T_in}")

    if hx is None:
        hx = jnp.zeros((B, H), jnp.float32)
    hx = hx.astype(jnp.float32)

    w_ih = params["w_ih"].astype(jnp.bfloat16)   # (D, 3H)  gates [r | z | n]
    w_hh = params["w_hh"].astype(jnp.bfloat16)   # (H, 3H)
    b_ih = params["b_ih"].astype(jnp.float32)    # (1, 3H)
    G = 3 * H

    # (B,T,D) -> (T,B,D): bf16 XLA glue over the smallest tensor so every
    # per-timestep ref access in the kernels is a leading-axis index.
    x_tb = jnp.transpose(x[:, :T, :], (1, 0, 2)).astype(jnp.bfloat16)
    x2 = x_tb.reshape(T * B, D)
    M = T * B

    # ---- 1) hoisted input projection: one MXU-saturating matmul -------------
    tm = _pick_block(M, block_m, 16)
    proj_vmem = 2 * (tm * D * 2 + tm * G * 2) + D * G * 2 + G * 4
    gi2 = pl.pallas_call(
        _input_proj_kernel,
        out_shape=jax.ShapeDtypeStruct((M, G), jnp.bfloat16),
        grid_spec=pltpu.PrefetchScalarGridSpec(
            num_scalar_prefetch=0,
            grid=(M // tm,),
            in_specs=[
                pl.BlockSpec((tm, D), lambda m: (m, 0)),    # x rows (pipelined)
                pl.BlockSpec((D, G), lambda m: (0, 0)),     # W_ih   (resident)
                pl.BlockSpec((1, G), lambda m: (0, 0)),     # b_ih   (resident)
            ],
            out_specs=pl.BlockSpec((tm, G), lambda m: (m, 0)),
        ),
        compiler_params=pltpu.CompilerParams(
            dimension_semantics=("parallel",),
            vmem_limit_bytes=_vmem_limit(proj_vmem)),
        cost_estimate=pl.CostEstimate(
            flops=2 * M * D * G,
            transcendentals=0,
            bytes_accessed=M * D * 2 + D * G * 2 + G * 4 + M * G * 2),
    )(x2, w_ih, b_ih)
    gi = gi2.reshape(T, B, G)

    # ---- 2) sequential scan, time-blocked, batch blocks core-parallel -------
    tt = _pick_divisor(T, block_t)      # leading dim of the 3D blocks
    bb = _pick_block(B, block_b, 16)    # sublane dim of the bf16 3D blocks
    scan_vmem = (2 * (tt * bb * G * 2 + tt * bb * H * 2)    # gi / out blocks
                 + 2 * (H * G * 2) + 2 * (2 * bb * H * 4)   # W_hh, h0, hT
                 + bb * H * 4)                              # carry scratch
    out_tb, h_last = pl.pallas_call(
        _gru_scan_kernel,
        out_shape=(jax.ShapeDtypeStruct((T, B, H), jnp.bfloat16),
                   jax.ShapeDtypeStruct((B, H), jnp.float32)),
        grid_spec=pltpu.PrefetchScalarGridSpec(
            num_scalar_prefetch=0,
            grid=(B // bb, T // tt),
            in_specs=[
                pl.BlockSpec((tt, bb, G), lambda b, t: (t, b, 0)),  # gi blocks
                pl.BlockSpec((bb, H), lambda b, t: (b, 0)),         # h0
                pl.BlockSpec((H, G), lambda b, t: (0, 0)),          # W_hh resident
            ],
            out_specs=[
                pl.BlockSpec((tt, bb, H), lambda b, t: (t, b, 0)),  # all steps
                pl.BlockSpec((bb, H), lambda b, t: (b, 0)),         # final h
            ],
            scratch_shapes=[pltpu.VMEM((bb, H), jnp.float32)],      # carried h
        ),
        compiler_params=pltpu.CompilerParams(
            dimension_semantics=("parallel", "arbitrary"),
            vmem_limit_bytes=_vmem_limit(scan_vmem)),
        cost_estimate=pl.CostEstimate(
            flops=2 * T * B * H * G + 12 * T * B * H,
            transcendentals=3 * T * B * H,
            bytes_accessed=(T * B * G * 2 + T * B * H * 2
                            + H * G * 2 + 2 * B * H * 4)),
    )(gi, hx, w_hh)

    # (T,B,H) -> (B,T,H): bf16 XLA glue (half the bytes of the old f32 path).
    output = jnp.transpose(out_tb, (1, 0, 2))
    return output, h_last


# ----------------------------------------------------------------------------
# Pure-JAX reference (identical bf16-matmul / f32-accumulate numerics)
# ----------------------------------------------------------------------------
def abstract_gru_reference(params, x, hx=None, max_length=None):
    B, T_in, D = x.shape
    H = params["w_hh"].shape[0]
    T = T_in if max_length is None else max_length
    if hx is None:
        hx = jnp.zeros((B, H), jnp.float32)
    w_ih = params["w_ih"].astype(jnp.bfloat16)
    w_hh = params["w_hh"].astype(jnp.bfloat16)
    b_ih = params["b_ih"].astype(jnp.float32)

    x_bf = x[:, :T, :].astype(jnp.bfloat16)
    gi = (jnp.einsum("btd,dg->btg", x_bf, w_ih,
                     preferred_element_type=jnp.float32) + b_ih)
    gi = gi.astype(jnp.bfloat16)

    def step(h, gi_t):                       # gi_t: (B, 3H) bf16
        g = gi_t.astype(jnp.float32)
        gh = jnp.dot(h.astype(jnp.bfloat16), w_hh,
                     preferred_element_type=jnp.float32)
        r = jax.nn.sigmoid(g[:, :H] + gh[:, :H])
        z = jax.nn.sigmoid(g[:, H:2 * H] + gh[:, H:2 * H])
        n = jnp.tanh(g[:, 2 * H:] + r * gh[:, 2 * H:])
        h_new = n + z * (h - n)
        return h_new, h_new.astype(jnp.bfloat16)

    h_last, ys = jax.lax.scan(step, hx.astype(jnp.float32),
                              jnp.transpose(gi, (1, 0, 2)))
    return jnp.transpose(ys, (1, 0, 2)), h_last


# ----------------------------------------------------------------------------
# Params: concatenated gate weights [r | z | n], stored pre-transposed (K, 3H),
# bias_ih=True, bias_hh=False (AbstractGRU defaults in sva_sym).
# TODO(synk): _load_gru_cell is abstract in the spec; this realizes the
# BayesianGRUCell used in sva_sym (eval-mode dropout == identity).
# ----------------------------------------------------------------------------
def init_params(key, *, input_size, hidden_size, scale=0.1):
    k1, k2, k3 = jax.random.split(key, 3)
    w_ih = scale * jax.random.normal(k1, (input_size, 3 * hidden_size),
                                     jnp.float32)
    w_hh = scale * jax.random.normal(k2, (hidden_size, 3 * hidden_size),
                                     jnp.float32)
    b_ih = scale * jax.random.normal(k3, (1, 3 * hidden_size), jnp.float32)
    return {"w_ih": w_ih.astype(jnp.bfloat16),
            "w_hh": w_hh.astype(jnp.bfloat16),
            "b_ih": b_ih.astype(jnp.float32)}


if __name__ == "__main__":
    B, T, D, H = 8, 32, 32, 32     # batch, seq, input_size, hidden_size

    key = jax.random.PRNGKey(0)
    kp, kx, kh = jax.random.split(key, 3)
    params = init_params(kp, input_size=D, hidden_size=H)
    x = jax.random.normal(kx, (B, T, D), dtype=jnp.float32)
    h0 = 0.1 * jax.random.normal(kh, (B, H), dtype=jnp.float32)

    gru = jax.jit(abstract_gru_forward, static_argnames=("max_length",))

    out, h_last = gru(params, x, h0)
    out = jax.block_until_ready(out)
    h_last = jax.block_until_ready(h_last)

    assert out.shape == (B, T, H) and out.dtype == jnp.bfloat16
    assert h_last.shape == (B, H) and h_last.dtype == jnp.float32
    assert bool(jnp.all(jnp.isfinite(h_last)))
    assert bool(jnp.all(jnp.isfinite(out.astype(jnp.float32))))

    ref_out, ref_h = abstract_gru_reference(params, x, hx=h0)
    np.testing.assert_allclose(np.asarray(out.astype(jnp.float32)),
                               np.asarray(ref_out.astype(jnp.float32)),
                               atol=2e-2, rtol=2e-2)
    np.testing.assert_allclose(np.asarray(h_last), np.asarray(ref_h),
                               atol=2e-2, rtol=2e-2)
    # last timestep of `out` must match the final state (bf16 rounding only)
    np.testing.assert_allclose(
        np.asarray(out[:, -1, :].astype(jnp.float32)),
        np.asarray(h_last.astype(jnp.bfloat16).astype(jnp.float32)),
        atol=1e-2, rtol=1e-2)

    # also exercise max_length < T and default hx=None paths
    out2, h2 = gru(params, x, max_length=16)
    out2 = jax.block_until_ready(out2)
    assert out2.shape == (B, 16, H)
    ref_out2, ref_h2 = abstract_gru_reference(params, x, max_length=16)
    np.testing.assert_allclose(np.asarray(h2), np.asarray(ref_h2),
                               atol=2e-2, rtol=2e-2)

    print("KERNEL_OK")
</pallas_src>

<mosaic_0001>
module attributes {stable_mosaic.version = 11 : i64} {
  func.func @_gru_scan_kernel(%arg0: i32, %arg1: i32, %arg2: memref<16x8x96xbf16, #tpu.memory_space<vmem>>, %arg3: memref<8x32xf32, #tpu.memory_space<vmem>>, %arg4: memref<32x96xbf16, #tpu.memory_space<vmem>>, %arg5: memref<16x8x32xbf16, #tpu.memory_space<vmem>>, %arg6: memref<8x32xf32, #tpu.memory_space<vmem>>, %arg7: memref<8x32xf32, #tpu.memory_space<vmem>>) attributes {dimension_semantics = [#tpu.dimension_semantics<parallel>, #tpu.dimension_semantics<arbitrary>], iteration_bounds = array<i64: 1, 2>, scalar_prefetch = 0 : i64, scratch_operands = 1 : i64, tpu.core_type = #tpu.core_type<tc>, window_params = [{transform_indices = @transform_0, window_bounds = array<i64: 16, 8, 96>}, {transform_indices = @transform_1, window_bounds = array<i64: 8, 32>}, {pipeline_mode = #tpu.pipeline_mode<synchronous>, transform_indices = @transform_2, window_bounds = array<i64: 32, 96>}, {transform_indices = @transform_3, window_bounds = array<i64: 16, 8, 32>}, {transform_indices = @transform_4, window_bounds = array<i64: 8, 32>}]} {
    %c0_i32 = arith.constant 0 : i32
    %0 = arith.cmpi eq, %arg1, %c0_i32 : i32
    %1 = arith.extui %0 : i1 to i32
    %c0_i32_0 = arith.constant 0 : i32
    %2 = arith.cmpi ne, %1, %c0_i32_0 : i32
    scf.if %2 {
      %c0_135 = arith.constant 0 : index
      %c0_136 = arith.constant 0 : index
      %537 = vector.load %arg3[%c0_135, %c0_136] : memref<8x32xf32, #tpu.memory_space<vmem>>, vector<8x32xf32>
      %c0_137 = arith.constant 0 : index
      %c0_138 = arith.constant 0 : index
      %538 = vector.load %arg7[%c0_137, %c0_138] : memref<8x32xf32, #tpu.memory_space<vmem>>, vector<8x32xf32>
      tpu.vector_store %arg7[%c0_137, %c0_138], %537 {strides = array<i32>} : memref<8x32xf32, #tpu.memory_space<vmem>>, vector<8x32xf32>,
    } else {
    }
    %c0 = arith.constant 0 : index
    %c0_1 = arith.constant 0 : index
    %3 = vector.load %arg4[%c0, %c0_1] : memref<32x96xbf16, #tpu.memory_space<vmem>>, vector<32x96xbf16>
    %c0_2 = arith.constant 0 : index
    %c0_3 = arith.constant 0 : index
    %4 = vector.load %arg7[%c0_2, %c0_3] : memref<8x32xf32, #tpu.memory_space<vmem>>, vector<8x32xf32>
    %c0_4 = arith.constant 0 : index
    %c0_5 = arith.constant 0 : index
    %c0_6 = arith.constant 0 : index
    %5 = vector.load %arg2[%c0_4, %c0_5, %c0_6] : memref<16x8x96xbf16, #tpu.memory_space<vmem>>, vector<1x8x96xbf16>
    %6 = vector.shape_cast %5 : vector<1x8x96xbf16> to vector<8x96xbf16>
    %7 = arith.extf %6 : vector<8x96xbf16> to vector<8x96xf32>
    %8 = arith.truncf %4 : vector<8x32xf32> to vector<8x32xbf16>
    %cst = arith.constant dense<0.000000e+00> : vector<8x96xf32>
    %9 = tpu.matmul %8, %3, %cst {dimension_numbers = #tpu.dot_dimension_numbers<[1], [0], [0], [1], [0, 0, 1, 1], [], []>} : vector<8x32xbf16>, vector<32x96xbf16>, vector<8x96xf32> -> vector<8x96xf32>
    %10 = vector.extract_strided_slice %7 {offsets = [0, 0], sizes = [8, 32], strides = [1, 1]} : vector<8x96xf32> to vector<8x32xf32>
    %11 = vector.extract_strided_slice %9 {offsets = [0, 0], sizes = [8, 32], strides = [1, 1]} : vector<8x96xf32> to vector<8x32xf32>
    %12 = arith.addf %10, %11 : vector<8x32xf32>
    %13 = arith.negf %12 : vector<8x32xf32>
    %14 = math.exp %13 : vector<8x32xf32>
    %cst_7 = arith.constant 1.000000e+00 : f32
    %15 = vector.broadcast %cst_7 : f32 to vector<8x32xf32>
    %16 = arith.addf %15, %14 : vector<8x32xf32>
    %17 = arith.divf %15, %16 : vector<8x32xf32>
    %18 = vector.extract_strided_slice %7 {offsets = [0, 32], sizes = [8, 32], strides = [1, 1]} : vector<8x96xf32> to vector<8x32xf32>
    %19 = vector.extract_strided_slice %9 {offsets = [0, 32], sizes = [8, 32], strides = [1, 1]} : vector<8x96xf32> to vector<8x32xf32>
    %20 = arith.addf %18, %19 : vector<8x32xf32>
    %21 = arith.negf %20 : vector<8x32xf32>
    %22 = math.exp %21 : vector<8x32xf32>
    %cst_8 = arith.constant 1.000000e+00 : f32
    %23 = vector.broadcast %cst_8 : f32 to vector<8x32xf32>
    %24 = arith.addf %23, %22 : vector<8x32xf32>
    %25 = arith.divf %23, %24 : vector<8x32xf32>
    %26 = vector.extract_strided_slice %7 {offsets = [0, 64], sizes = [8, 32], strides = [1, 1]} : vector<8x96xf32> to vector<8x32xf32>
    %27 = vector.extract_strided_slice %9 {offsets = [0, 64], sizes = [8, 32], strides = [1, 1]} : vector<8x96xf32> to vector<8x32xf32>
    %28 = arith.mulf %17, %27 : vector<8x32xf32>
    %29 = arith.addf %26, %28 : vector<8x32xf32>
    %30 = math.tanh %29 : vector<8x32xf32>
    %31 = arith.subf %4, %30 : vector<8x32xf32>
    %32 = arith.mulf %25, %31 : vector<8x32xf32>
    %33 = arith.addf %30, %32 : vector<8x32xf32>
    %34 = arith.truncf %33 : vector<8x32xf32> to vector<8x32xbf16>
    %c0_9 = arith.constant 0 : index
    %c0_10 = arith.constant 0 : index
    %c0_11 = arith.constant 0 : index
    %35 = vector.load %arg5[%c0_9, %c0_10, %c0_11] : memref<16x8x32xbf16, #tpu.memory_space<vmem>>, vector<1x8x32xbf16>
    %36 = vector.shape_cast %35 : vector<1x8x32xbf16> to vector<8x32xbf16>
    %37 = vector.shape_cast %34 : vector<8x32xbf16> to vector<1x8x32xbf16>
    tpu.vector_store %arg5[%c0_9, %c0_10, %c0_11], %37 {strides = array<i32>} : memref<16x8x32xbf16, #tpu.memory_space<vmem>>, vector<1x8x32xbf16>,
    %c1 = arith.constant 1 : index
    %c0_12 = arith.constant 0 : index
    %c0_13 = arith.constant 0 : index
    %38 = vector.load %arg2[%c1, %c0_12, %c0_13] : memref<16x8x96xbf16, #tpu.memory_space<vmem>>, vector<1x8x96xbf16>
    %39 = vector.shape_cast %38 : vector<1x8x96xbf16> to vector<8x96xbf16>
    %40 = arith.extf %39 : vector<8x96xbf16> to vector<8x96xf32>
    %41 = arith.truncf %33 : vector<8x32xf32> to vector<8x32xbf16>
    %cst_14 = arith.constant dense<0.000000e+00> : vector<8x96xf32>
    %42 = tpu.matmul %41, %3, %cst_14 {dimension_numbers = #tpu.dot_dimension_numbers<[1], [0], [0], [1], [0, 0, 1, 1], [], []>} : vector<8x32xbf16>, vector<32x96xbf16>, vector<8x96xf32> -> vector<8x96xf32>
    %43 = vector.extract_strided_slice %40 {offsets = [0, 0], sizes = [8, 32], strides = [1, 1]} : vector<8x96xf32> to vector<8x32xf32>
    %44 = vector.extract_strided_slice %42 {offsets = [0, 0], sizes = [8, 32], strides = [1, 1]} : vector<8x96xf32> to vector<8x32xf32>
    %45 = arith.addf %43, %44 : vector<8x32xf32>
    %46 = arith.negf %45 : vector<8x32xf32>
    %47 = math.exp %46 : vector<8x32xf32>
    %cst_15 = arith.constant 1.000000e+00 : f32
    %48 = vector.broadcast %cst_15 : f32 to vector<8x32xf32>
    %49 = arith.addf %48, %47 : vector<8x32xf32>
    %50 = arith.divf %48, %49 : vector<8x32xf32>
    %51 = vector.extract_strided_slice %40 {offsets = [0, 32], sizes = [8, 32], strides = [1, 1]} : vector<8x96xf32> to vector<8x32xf32>
    %52 = vector.extract_strided_slice %42 {offsets = [0, 32], sizes = [8, 32], strides = [1, 1]} : vector<8x96xf32> to vector<8x32xf32>
    %53 = arith.addf %51, %52 : vector<8x32xf32>
    %54 = arith.negf %53 : vector<8x32xf32>
    %55 = math.exp %54 : vector<8x32xf32>
    %cst_16 = arith.constant 1.000000e+00 : f32
    %56 = vector.broadcast %cst_16 : f32 to vector<8x32xf32>
    %57 = arith.addf %56, %55 : vector<8x32xf32>
    %58 = arith.divf %56, %57 : vector<8x32xf32>
    %59 = vector.extract_strided_slice %40 {offsets = [0, 64], sizes = [8, 32], strides = [1, 1]} : vector<8x96xf32> to vector<8x32xf32>
    %60 = vector.extract_strided_slice %42 {offsets = [0, 64], sizes = [8, 32], strides = [1, 1]} : vector<8x96xf32> to vector<8x32xf32>
    %61 = arith.mulf %50, %60 : vector<8x32xf32>
    %62 = arith.addf %59, %61 : vector<8x32xf32>
    %63 = math.tanh %62 : vector<8x32xf32>
    %64 = arith.subf %33, %63 : vector<8x32xf32>
    %65 = arith.mulf %58, %64 : vector<8x32xf32>
    %66 = arith.addf %63, %65 : vector<8x32xf32>
    %67 = arith.truncf %66 : vector<8x32xf32> to vector<8x32xbf16>
    %c1_17 = arith.constant 1 : index
    %c0_18 = arith.constant 0 : index
    %c0_19 = arith.constant 0 : index
    %68 = vector.load %arg5[%c1_17, %c0_18, %c0_19] : memref<16x8x32xbf16, #tpu.memory_space<vmem>>, vector<1x8x32xbf16>
    %69 = vector.shape_cast %68 : vector<1x8x32xbf16> to vector<8x32xbf16>
    %70 = vector.shape_cast %67 : vector<8x32xbf16> to vector<1x8x32xbf16>
    tpu.vector_store %arg5[%c1_17, %c0_18, %c0_19], %70 {strides = array<i32>} : memref<16x8x32xbf16, #tpu.memory_space<vmem>>, vector<1x8x32xbf16>,
    %c2 = arith.constant 2 : index
    %c0_20 = arith.constant 0 : index
    %c0_21 = arith.constant 0 : index
    %71 = vector.load %arg2[%c2, %c0_20, %c0_21] : memref<16x8x96xbf16, #tpu.memory_space<vmem>>, vector<1x8x96xbf16>
    %72 = vector.shape_cast %71 : vector<1x8x96xbf16> to vector<8x96xbf16>
    %73 = arith.extf %72 : vector<8x96xbf16> to vector<8x96xf32>
    %74 = arith.truncf %66 : vector<8x32xf32> to vector<8x32xbf16>
    %cst_22 = arith.constant dense<0.000000e+00> : vector<8x96xf32>
    %75 = tpu.matmul %74, %3, %cst_22 {dimension_numbers = #tpu.dot_dimension_numbers<[1], [0], [0], [1], [0, 0, 1, 1], [], []>} : vector<8x32xbf16>, vector<32x96xbf16>, vector<8x96xf32> -> vector<8x96xf32>
    %76 = vector.extract_strided_slice %73 {offsets = [0, 0], sizes = [8, 32], strides = [1, 1]} : vector<8x96xf32> to vector<8x32xf32>
    %77 = vector.extract_strided_slice %75 {offsets = [0, 0], sizes = [8, 32], strides = [1, 1]} : vector<8x96xf32> to vector<8x32xf32>
    %78 = arith.addf %76, %77 : vector<8x32xf32>
    %79 = arith.negf %78 : vector<8x32xf32>
    %80 = math.exp %79 : vector<8x32xf32>
    %cst_23 = arith.constant 1.000000e+00 : f32
    %81 = vector.broadcast %cst_23 : f32 to vector<8x32xf32>
    %82 = arith.addf %81, %80 : vector<8x32xf32>
    %83 = arith.divf %81, %82 : vector<8x32xf32>
    %84 = vector.extract_strided_slice %73 {offsets = [0, 32], sizes = [8, 32], strides = [1, 1]} : vector<8x96xf32> to vector<8x32xf32>
    %85 = vector.extract_strided_slice %75 {offsets = [0, 32], sizes = [8, 32], strides = [1, 1]} : vector<8x96xf32> to vector<8x32xf32>
    %86 = arith.addf %84, %85 : vector<8x32xf32>
    %87 = arith.negf %86 : vector<8x32xf32>
    %88 = math.exp %87 : vector<8x32xf32>
    %cst_24 = arith.constant 1.000000e+00 : f32
    %89 = vector.broadcast %cst_24 : f32 to vector<8x32xf32>
    %90 = arith.addf %89, %88 : vector<8x32xf32>
    %91 = arith.divf %89, %90 : vector<8x32xf32>
    %92 = vector.extract_strided_slice %73 {offsets = [0, 64], sizes = [8, 32], strides = [1, 1]} : vector<8x96xf32> to vector<8x32xf32>
    %93 = vector.extract_strided_slice %75 {offsets = [0, 64], sizes = [8, 32], strides = [1, 1]} : vector<8x96xf32> to vector<8x32xf32>
    %94 = arith.mulf %83, %93 : vector<8x32xf32>
    %95 = arith.addf %92, %94 : vector<8x32xf32>
    %96 = math.tanh %95 : vector<8x32xf32>
    %97 = arith.subf %66, %96 : vector<8x32xf32>
    %98 = arith.mulf %91, %97 : vector<8x32xf32>
    %99 = arith.addf %96, %98 : vector<8x32xf32>
    %100 = arith.truncf %99 : vector<8x32xf32> to vector<8x32xbf16>
    %c2_25 = arith.constant 2 : index
    %c0_26 = arith.constant 0 : index
    %c0_27 = arith.constant 0 : index
    %101 = vector.load %arg5[%c2_25, %c0_26, %c0_27] : memref<16x8x32xbf16, #tpu.memory_space<vmem>>, vector<1x8x32xbf16>
    %102 = vector.shape_cast %101 : vector<1x8x32xbf16> to vector<8x32xbf16>
    %103 = vector.shape_cast %100 : vector<8x32xbf16> to vector<1x8x32xbf16>
    tpu.vector_store %arg5[%c2_25, %c0_26, %c0_27], %103 {strides = array<i32>} : memref<16x8x32xbf16, #tpu.memory_space<vmem>>, vector<1x8x32xbf16>,
    %c3 = arith.constant 3 : index
    %c0_28 = arith.constant 0 : index
    %c0_29 = arith.constant 0 : index
    %104 = vector.load %arg2[%c3, %c0_28, %c0_29] : memref<16x8x96xbf16, #tpu.memory_space<vmem>>, vector<1x8x96xbf16>
    %105 = vector.shape_cast %104 : vector<1x8x96xbf16> to vector<8x96xbf16>
    %106 = arith.extf %105 : vector<8x96xbf16> to vector<8x96xf32>
    %107 = arith.truncf %99 : vector<8x32xf32> to vector<8x32xbf16>
    %cst_30 = arith.constant dense<0.000000e+00> : vector<8x96xf32>
    %108 = tpu.matmul %107, %3, %cst_30 {dimension_numbers = #tpu.dot_dimension_numbers<[1], [0], [0], [1], [0, 0, 1, 1], [], []>} : vector<8x32xbf16>, vector<32x96xbf16>, vector<8x96xf32> -> vector<8x96xf32>
    %109 = vector.extract_strided_slice %106 {offsets = [0, 0], sizes = [8, 32], strides = [1, 1]} : vector<8x96xf32> to vector<8x32xf32>
    %110 = vector.extract_strided_slice %108 {offsets = [0, 0], sizes = [8, 32], strides = [1, 1]} : vector<8x96xf32> to vector<8x32xf32>
    %111 = arith.addf %109, %110 : vector<8x32xf32>
    %112 = arith.negf %111 : vector<8x32xf32>
    %113 = math.exp %112 : vector<8x32xf32>
    %cst_31 = arith.constant 1.000000e+00 : f32
    %114 = vector.broadcast %cst_31 : f32 to vector<8x32xf32>
    %115 = arith.addf %114, %113 : vector<8x32xf32>
    %116 = arith.divf %114, %115 : vector<8x32xf32>
    %117 = vector.extract_strided_slice %106 {offsets = [0, 32], sizes = [8, 32], strides = [1, 1]} : vector<8x96xf32> to vector<8x32xf32>
    %118 = vector.extract_strided_slice %108 {offsets = [0, 32], sizes = [8, 32], strides = [1, 1]} : vector<8x96xf32> to vector<8x32xf32>
    %119 = arith.addf %117, %118 : vector<8x32xf32>
    %120 = arith.negf %119 : vector<8x32xf32>
    %121 = math.exp %120 : vector<8x32xf32>
    %cst_32 = arith.constant 1.000000e+00 : f32
    %122 = vector.broadcast %cst_32 : f32 to vector<8x32xf32>
    %123 = arith.addf %122, %121 : vector<8x32xf32>
    %124 = arith.divf %122, %123 : vector<8x32xf32>
    %125 = vector.extract_strided_slice %106 {offsets = [0, 64], sizes = [8, 32], strides = [1, 1]} : vector<8x96xf32> to vector<8x32xf32>
    %126 = vector.extract_strided_slice %108 {offsets = [0, 64], sizes = [8, 32], strides = [1, 1]} : vector<8x96xf32> to vector<8x32xf32>
    %127 = arith.mulf %116, %126 : vector<8x32xf32>
    %128 = arith.addf %125, %127 : vector<8x32xf32>
    %129 = math.tanh %128 : vector<8x32xf32>
    %130 = arith.subf %99, %129 : vector<8x32xf32>
    %131 = arith.mulf %124, %130 : vector<8x32xf32>
    %132 = arith.addf %129, %131 : vector<8x32xf32>
    %133 = arith.truncf %132 : vector<8x32xf32> to vector<8x32xbf16>
    %c3_33 = arith.constant 3 : index
    %c0_34 = arith.constant 0 : index
    %c0_35 = arith.constant 0 : index
    %134 = vector.load %arg5[%c3_33, %c0_34, %c0_35] : memref<16x8x32xbf16, #tpu.memory_space<vmem>>, vector<1x8x32xbf16>
    %135 = vector.shape_cast %134 : vector<1x8x32xbf16> to vector<8x32xbf16>
    %136 = vector.shape_cast %133 : vector<8x32xbf16> to vector<1x8x32xbf16>
    tpu.vector_store %arg5[%c3_33, %c0_34, %c0_35], %136 {strides = array<i32>} : memref<16x8x32xbf16, #tpu.memory_space<vmem>>, vector<1x8x32xbf16>,
    %c4 = arith.constant 4 : index
    %c0_36 = arith.constant 0 : index
    %c0_37 = arith.constant 0 : index
    %137 = vector.load %arg2[%c4, %c0_36, %c0_37] : memref<16x8x96xbf16, #tpu.memory_space<vmem>>, vector<1x8x96xbf16>
    %138 = vector.shape_cast %137 : vector<1x8x96xbf16> to vector<8x96xbf16>
    %139 = arith.extf %138 : vector<8x96xbf16> to vector<8x96xf32>
    %140 = arith.truncf %132 : vector<8x32xf32> to vector<8x32xbf16>
    %cst_38 = arith.constant dense<0.000000e+00> : vector<8x96xf32>
    %141 = tpu.matmul %140, %3, %cst_38 {dimension_numbers = #tpu.dot_dimension_numbers<[1], [0], [0], [1], [0, 0, 1, 1], [], []>} : vector<8x32xbf16>, vector<32x96xbf16>, vector<8x96xf32> -> vector<8x96xf32>
    %142 = vector.extract_strided_slice %139 {offsets = [0, 0], sizes = [8, 32], strides = [1, 1]} : vector<8x96xf32> to vector<8x32xf32>
    %143 = vector.extract_strided_slice %141 {offsets = [0, 0], sizes = [8, 32], strides = [1, 1]} : vector<8x96xf32> to vector<8x32xf32>
    %144 = arith.addf %142, %143 : vector<8x32xf32>
    %145 = arith.negf %144 : vector<8x32xf32>
    %146 = math.exp %145 : vector<8x32xf32>
    %cst_39 = arith.constant 1.000000e+00 : f32
    %147 = vector.broadcast %cst_39 : f32 to vector<8x32xf32>
    %148 = arith.addf %147, %146 : vector<8x32xf32>
    %149 = arith.divf %147, %148 : vector<8x32xf32>
    %150 = vector.extract_strided_slice %139 {offsets = [0, 32], sizes = [8, 32], strides = [1, 1]} : vector<8x96xf32> to vector<8x32xf32>
    %151 = vector.extract_strided_slice %141 {offsets = [0, 32], sizes = [8, 32], strides = [1, 1]} : vector<8x96xf32> to vector<8x32xf32>
    %152 = arith.addf %150, %151 : vector<8x32xf32>
    %153 = arith.negf %152 : vector<8x32xf32>
    %154 = math.exp %153 : vector<8x32xf32>
    %cst_40 = arith.constant 1.000000e+00 : f32
    %155 = vector.broadcast %cst_40 : f32 to vector<8x32xf32>
    %156 = arith.addf %155, %154 : vector<8x32xf32>
    %157 = arith.divf %155, %156 : vector<8x32xf32>
    %158 = vector.extract_strided_slice %139 {offsets = [0, 64], sizes = [8, 32], strides = [1, 1]} : vector<8x96xf32> to vector<8x32xf32>
    %159 = vector.extract_strided_slice %141 {offsets = [0, 64], sizes = [8, 32], strides = [1, 1]} : vector<8x96xf32> to vector<8x32xf32>
    %160 = arith.mulf %149, %159 : vector<8x32xf32>
    %161 = arith.addf %158, %160 : vector<8x32xf32>
    %162 = math.tanh %161 : vector<8x32xf32>
    %163 = arith.subf %132, %162 : vector<8x32xf32>
    %164 = arith.mulf %157, %163 : vector<8x32xf32>
    %165 = arith.addf %162, %164 : vector<8x32xf32>
    %166 = arith.truncf %165 : vector<8x32xf32> to vector<8x32xbf16>
    %c4_41 = arith.constant 4 : index
    %c0_42 = arith.constant 0 : index
    %c0_43 = arith.constant 0 : index
    %167 = vector.load %arg5[%c4_41, %c0_42, %c0_43] : memref<16x8x32xbf16, #tpu.memory_space<vmem>>, vector<1x8x32xbf16>
    %168 = vector.shape_cast %167 : vector<1x8x32xbf16> to vector<8x32xbf16>
    %169 = vector.shape_cast %166 : vector<8x32xbf16> to vector<1x8x32xbf16>
    tpu.vector_store %arg5[%c4_41, %c0_42, %c0_43], %169 {strides = array<i32>} : memref<16x8x32xbf16, #tpu.memory_space<vmem>>, vector<1x8x32xbf16>,
    %c5 = arith.constant 5 : index
    %c0_44 = arith.constant 0 : index
    %c0_45 = arith.constant 0 : index
    %170 = vector.load %arg2[%c5, %c0_44, %c0_45] : memref<16x8x96xbf16, #tpu.memory_space<vmem>>, vector<1x8x96xbf16>
    %171 = vector.shape_cast %170 : vector<1x8x96xbf16> to vector<8x96xbf16>
    %172 = arith.extf %171 : vector<8x96xbf16> to vector<8x96xf32>
    %173 = arith.truncf %165 : vector<8x32xf32> to vector<8x32xbf16>
    %cst_46 = arith.constant dense<0.000000e+00> : vector<8x96xf32>
    %174 = tpu.matmul %173, %3, %cst_46 {dimension_numbers = #tpu.dot_dimension_numbers<[1], [0], [0], [1], [0, 0, 1, 1], [], []>} : vector<8x32xbf16>, vector<32x96xbf16>, vector<8x96xf32> -> vector<8x96xf32>
    %175 = vector.extract_strided_slice %172 {offsets = [0, 0], sizes = [8, 32], strides = [1, 1]} : vector<8x96xf32> to vector<8x32xf32>
    %176 = vector.extract_strided_slice %174 {offsets = [0, 0], sizes = [8, 32], strides = [1, 1]} : vector<8x96xf32> to vector<8x32xf32>
    %177 = arith.addf %175, %176 : vector<8x32xf32>
    %178 = arith.negf %177 : vector<8x32xf32>
    %179 = math.exp %178 : vector<8x32xf32>
    %cst_47 = arith.constant 1.000000e+00 : f32
    %180 = vector.broadcast %cst_47 : f32 to vector<8x32xf32>
    %181 = arith.addf %180, %179 : vector<8x32xf32>
    %182 = arith.divf %180, %181 : vector<8x32xf32>
    %183 = vector.extract_strided_slice %172 {offsets = [0, 32], sizes = [8, 32], strides = [1, 1]} : vector<8x96xf32> to vector<8x32xf32>
    %184 = vector.extract_strided_slice %174 {offsets = [0, 32], sizes = [8, 32], strides = [1, 1]} : vector<8x96xf32> to vector<8x32xf32>
    %185 = arith.addf %183, %184 : vector<8x32xf32>
    %186 = arith.negf %185 : vector<8x32xf32>
    %187 = math.exp %186 : vector<8x32xf32>
    %cst_48 = arith.constant 1.000000e+00 : f32
    %188 = vector.broadcast %cst_48 : f32 to vector<8x32xf32>
    %189 = arith.addf %188, %187 : vector<8x32xf32>
    %190 = arith.divf %188, %189 : vector<8x32xf32>
    %191 = vector.extract_strided_slice %172 {offsets = [0, 64], sizes = [8, 32], strides = [1, 1]} : vector<8x96xf32> to vector<8x32xf32>
    %192 = vector.extract_strided_slice %174 {offsets = [0, 64], sizes = [8, 32], strides = [1, 1]} : vector<8x96xf32> to vector<8x32xf32>
    %193 = arith.mulf %182, %192 : vector<8x32xf32>
    %194 = arith.addf %191, %193 : vector<8x32xf32>
    %195 = math.tanh %194 : vector<8x32xf32>
    %196 = arith.subf %165, %195 : vector<8x32xf32>
    %197 = arith.mulf %190, %196 : vector<8x32xf32>
    %198 = arith.addf %195, %197 : vector<8x32xf32>
    %199 = arith.truncf %198 : vector<8x32xf32> to vector<8x32xbf16>
    %c5_49 = arith.constant 5 : index
    %c0_50 = arith.constant 0 : index
    %c0_51 = arith.constant 0 : index
    %200 = vector.load %arg5[%c5_49, %c0_50, %c0_51] : memref<16x8x32xbf16, #tpu.memory_space<vmem>>, vector<1x8x32xbf16>
    %201 = vector.shape_cast %200 : vector<1x8x32xbf16> to vector<8x32xbf16>
    %202 = vector.shape_cast %199 : vector<8x32xbf16> to vector<1x8x32xbf16>
    tpu.vector_store %arg5[%c5_49, %c0_50, %c0_51], %202 {strides = array<i32>} : memref<16x8x32xbf16, #tpu.memory_space<vmem>>, vector<1x8x32xbf16>,
    %c6 = arith.constant 6 : index
    %c0_52 = arith.constant 0 : index
    %c0_53 = arith.constant 0 : index
    %203 = vector.load %arg2[%c6, %c0_52, %c0_53] : memref<16x8x96xbf16, #tpu.memory_space<vmem>>, vector<1x8x96xbf16>
    %204 = vector.shape_cast %203 : vector<1x8x96xbf16> to vector<8x96xbf16>
    %205 = arith.extf %204 : vector<8x96xbf16> to vector<8x96xf32>
    %206 = arith.truncf %198 : vector<8x32xf32> to vector<8x32xbf16>
    %cst_54 = arith.constant dense<0.000000e+00> : vector<8x96xf32>
    %207 = tpu.matmul %206, %3, %cst_54 {dimension_numbers = #tpu.dot_dimension_numbers<[1], [0], [0], [1], [0, 0, 1, 1], [], []>} : vector<8x32xbf16>, vector<32x96xbf16>, vector<8x96xf32> -> vector<8x96xf32>
    %208 = vector.extract_strided_slice %205 {offsets = [0, 0], sizes = [8, 32], strides = [1, 1]} : vector<8x96xf32> to vector<8x32xf32>
    %209 = vector.extract_strided_slice %207 {offsets = [0, 0], sizes = [8, 32], strides = [1, 1]} : vector<8x96xf32> to vector<8x32xf32>
    %210 = arith.addf %208, %209 : vector<8x32xf32>
    %211 = arith.negf %210 : vector<8x32xf32>
    %212 = math.exp %211 : vector<8x32xf32>
    %cst_55 = arith.constant 1.000000e+00 : f32
    %213 = vector.broadcast %cst_55 : f32 to vector<8x32xf32>
    %214 = arith.addf %213, %212 : vector<8x32xf32>
    %215 = arith.divf %213, %214 : vector<8x32xf32>
    %216 = vector.extract_strided_slice %205 {offsets = [0, 32], sizes = [8, 32], strides = [1, 1]} : vector<8x96xf32> to vector<8x32xf32>
    %217 = vector.extract_strided_slice %207 {offsets = [0, 32], sizes = [8, 32], strides = [1, 1]} : vector<8x96xf32> to vector<8x32xf32>
    %218 = arith.addf %216, %217 : vector<8x32xf32>
    %219 = arith.negf %218 : vector<8x32xf32>
    %220 = math.exp %219 : vector<8x32xf32>
    %cst_56 = arith.constant 1.000000e+00 : f32
    %221 = vector.broadcast %cst_56 : f32 to vector<8x32xf32>
    %222 = arith.addf %221, %220 : vector<8x32xf32>
    %223 = arith.divf %221, %222 : vector<8x32xf32>
    %224 = vector.extract_strided_slice %205 {offsets = [0, 64], sizes = [8, 32], strides = [1, 1]} : vector<8x96xf32> to vector<8x32xf32>
    %225 = vector.extract_strided_slice %207 {offsets = [0, 64], sizes = [8, 32], strides = [1, 1]} : vector<8x96xf32> to vector<8x32xf32>
    %226 = arith.mulf %215, %225 : vector<8x32xf32>
    %227 = arith.addf %224, %226 : vector<8x32xf32>
    %228 = math.tanh %227 : vector<8x32xf32>
    %229 = arith.subf %198, %228 : vector<8x32xf32>
    %230 = arith.mulf %223, %229 : vector<8x32xf32>
    %231 = arith.addf %228, %230 : vector<8x32xf32>
    %232 = arith.truncf %231 : vector<8x32xf32> to vector<8x32xbf16>
    %c6_57 = arith.constant 6 : index
    %c0_58 = arith.constant 0 : index
    %c0_59 = arith.constant 0 : index
    %233 = vector.load %arg5[%c6_57, %c0_58, %c0_59] : memref<16x8x32xbf16, #tpu.memory_space<vmem>>, vector<1x8x32xbf16>
    %234 = vector.shape_cast %233 : vector<1x8x32xbf16> to vector<8x32xbf16>
    %235 = vector.shape_cast %232 : vector<8x32xbf16> to vector<1x8x32xbf16>
    tpu.vector_store %arg5[%c6_57, %c0_58, %c0_59], %235 {strides = array<i32>} : memref<16x8x32xbf16, #tpu.memory_space<vmem>>, vector<1x8x32xbf16>,
    %c7 = arith.constant 7 : index
    %c0_60 = arith.constant 0 : index
    %c0_61 = arith.constant 0 : index
    %236 = vector.load %arg2[%c7, %c0_60, %c0_61] : memref<16x8x96xbf16, #tpu.memory_space<vmem>>, vector<1x8x96xbf16>
    %237 = vector.shape_cast %236 : vector<1x8x96xbf16> to vector<8x96xbf16>
    %238 = arith.extf %237 : vector<8x96xbf16> to vector<8x96xf32>
    %239 = arith.truncf %231 : vector<8x32xf32> to vector<8x32xbf16>
    %cst_62 = arith.constant dense<0.000000e+00> : vector<8x96xf32>
    %240 = tpu.matmul %239, %3, %cst_62 {dimension_numbers = #tpu.dot_dimension_numbers<[1], [0], [0], [1], [0, 0, 1, 1], [], []>} : vector<8x32xbf16>, vector<32x96xbf16>, vector<8x96xf32> -> vector<8x96xf32>
    %241 = vector.extract_strided_slice %238 {offsets = [0, 0], sizes = [8, 32], strides = [1, 1]} : vector<8x96xf32> to vector<8x32xf32>
    %242 = vector.extract_strided_slice %240 {offsets = [0, 0], sizes = [8, 32], strides = [1, 1]} : vector<8x96xf32> to vector<8x32xf32>
    %243 = arith.addf %241, %242 : vector<8x32xf32>
    %244 = arith.negf %243 : vector<8x32xf32>
    %245 = math.exp %244 : vector<8x32xf32>
    %cst_63 = arith.constant 1.000000e+00 : f32
    %246 = vector.broadcast %cst_63 : f32 to vector<8x32xf32>
    %247 = arith.addf %246, %245 : vector<8x32xf32>
    %248 = arith.divf %246, %247 : vector<8x32xf32>
    %249 = vector.extract_strided_slice %238 {offsets = [0, 32], sizes = [8, 32], strides = [1, 1]} : vector<8x96xf32> to vector<8x32xf32>
    %250 = vector.extract_strided_slice %240 {offsets = [0, 32], sizes = [8, 32], strides = [1, 1]} : vector<8x96xf32> to vector<8x32xf32>
    %251 = arith.addf %249, %250 : vector<8x32xf32>
    %252 = arith.negf %251 : vector<8x32xf32>
    %253 = math.exp %252 : vector<8x32xf32>
    %cst_64 = arith.constant 1.000000e+00 : f32
    %254 = vector.broadcast %cst_64 : f32 to vector<8x32xf32>
    %255 = arith.addf %254, %253 : vector<8x32xf32>
    %256 = arith.divf %254, %255 : vector<8x32xf32>
    %257 = vector.extract_strided_slice %238 {offsets = [0, 64], sizes = [8, 32], strides = [1, 1]} : vector<8x96xf32> to vector<8x32xf32>
    %258 = vector.extract_strided_slice %240 {offsets = [0, 64], sizes = [8, 32], strides = [1, 1]} : vector<8x96xf32> to vector<8x32xf32>
    %259 = arith.mulf %248, %258 : vector<8x32xf32>
    %260 = arith.addf %257, %259 : vector<8x32xf32>
    %261 = math.tanh %260 : vector<8x32xf32>
    %262 = arith.subf %231, %261 : vector<8x32xf32>
    %263 = arith.mulf %256, %262 : vector<8x32xf32>
    %264 = arith.addf %261, %263 : vector<8x32xf32>
    %265 = arith.truncf %264 : vector<8x32xf32> to vector<8x32xbf16>
    %c7_65 = arith.constant 7 : index
    %c0_66 = arith.constant 0 : index
    %c0_67 = arith.constant 0 : index
    %266 = vector.load %arg5[%c7_65, %c0_66, %c0_67] : memref<16x8x32xbf16, #tpu.memory_space<vmem>>, vector<1x8x32xbf16>
    %267 = vector.shape_cast %266 : vector<1x8x32xbf16> to vector<8x32xbf16>
    %268 = vector.shape_cast %265 : vector<8x32xbf16> to vector<1x8x32xbf16>
    tpu.vector_store %arg5[%c7_65, %c0_66, %c0_67], %268 {strides = array<i32>} : memref<16x8x32xbf16, #tpu.memory_space<vmem>>, vector<1x8x32xbf16>,
    %c8 = arith.constant 8 : index
    %c0_68 = arith.constant 0 : index
    %c0_69 = arith.constant 0 : index
    %269 = vector.load %arg2[%c8, %c0_68, %c0_69] : memref<16x8x96xbf16, #tpu.memory_space<vmem>>, vector<1x8x96xbf16>
    %270 = vector.shape_cast %269 : vector<1x8x96xbf16> to vector<8x96xbf16>
    %271 = arith.extf %270 : vector<8x96xbf16> to vector<8x96xf32>
    %272 = arith.truncf %264 : vector<8x32xf32> to vector<8x32xbf16>
    %cst_70 = arith.constant dense<0.000000e+00> : vector<8x96xf32>
    %273 = tpu.matmul %272, %3, %cst_70 {dimension_numbers = #tpu.dot_dimension_numbers<[1], [0], [0], [1], [0, 0, 1, 1], [], []>} : vector<8x32xbf16>, vector<32x96xbf16>, vector<8x96xf32> -> vector<8x96xf32>
    %274 = vector.extract_strided_slice %271 {offsets = [0, 0], sizes = [8, 32], strides = [1, 1]} : vector<8x96xf32> to vector<8x32xf32>
    %275 = vector.extract_strided_slice %273 {offsets = [0, 0], sizes = [8, 32], strides = [1, 1]} : vector<8x96xf32> to vector<8x32xf32>
    %276 = arith.addf %274, %275 : vector<8x32xf32>
    %277 = arith.negf %276 : vector<8x32xf32>
    %278 = math.exp %277 : vector<8x32xf32>
    %cst_71 = arith.constant 1.000000e+00 : f32
    %279 = vector.broadcast %cst_71 : f32 to vector<8x32xf32>
    %280 = arith.addf %279, %278 : vector<8x32xf32>
    %281 = arith.divf %279, %280 : vector<8x32xf32>
    %282 = vector.extract_strided_slice %271 {offsets = [0, 32], sizes = [8, 32], strides = [1, 1]} : vector<8x96xf32> to vector<8x32xf32>
    %283 = vector.extract_strided_slice %273 {offsets = [0, 32], sizes = [8, 32], strides = [1, 1]} : vector<8x96xf32> to vector<8x32xf32>
    %284 = arith.addf %282, %283 : vector<8x32xf32>
    %285 = arith.negf %284 : vector<8x32xf32>
    %286 = math.exp %285 : vector<8x32xf32>
    %cst_72 = arith.constant 1.000000e+00 : f32
    %287 = vector.broadcast %cst_72 : f32 to vector<8x32xf32>
    %288 = arith.addf %287, %286 : vector<8x32xf32>
    %289 = arith.divf %287, %288 : vector<8x32xf32>
    %290 = vector.extract_strided_slice %271 {offsets = [0, 64], sizes = [8, 32], strides = [1, 1]} : vector<8x96xf32> to vector<8x32xf32>
    %291 = vector.extract_strided_slice %273 {offsets = [0, 64], sizes = [8, 32], strides = [1, 1]} : vector<8x96xf32> to vector<8x32xf32>
    %292 = arith.mulf %281, %291 : vector<8x32xf32>
    %293 = arith.addf %290, %292 : vector<8x32xf32>
    %294 = math.tanh %293 : vector<8x32xf32>
    %295 = arith.subf %264, %294 : vector<8x32xf32>
    %296 = arith.mulf %289, %295 : vector<8x32xf32>
    %297 = arith.addf %294, %296 : vector<8x32xf32>
    %298 = arith.truncf %297 : vector<8x32xf32> to vector<8x32xbf16>
    %c8_73 = arith.constant 8 : index
    %c0_74 = arith.constant 0 : index
    %c0_75 = arith.constant 0 : index
    %299 = vector.load %arg5[%c8_73, %c0_74, %c0_75] : memref<16x8x32xbf16, #tpu.memory_space<vmem>>, vector<1x8x32xbf16>
    %300 = vector.shape_cast %299 : vector<1x8x32xbf16> to vector<8x32xbf16>
    %301 = vector.shape_cast %298 : vector<8x32xbf16> to vector<1x8x32xbf16>
    tpu.vector_store %arg5[%c8_73, %c0_74, %c0_75], %301 {strides = array<i32>} : memref<16x8x32xbf16, #tpu.memory_space<vmem>>, vector<1x8x32xbf16>,
    %c9 = arith.constant 9 : index
    %c0_76 = arith.constant 0 : index
    %c0_77 = arith.constant 0 : index
    %302 = vector.load %arg2[%c9, %c0_76, %c0_77] : memref<16x8x96xbf16, #tpu.memory_space<vmem>>, vector<1x8x96xbf16>
    %303 = vector.shape_cast %302 : vector<1x8x96xbf16> to vector<8x96xbf16>
    %304 = arith.extf %303 : vector<8x96xbf16> to vector<8x96xf32>
    %305 = arith.truncf %297 : vector<8x32xf32> to vector<8x32xbf16>
    %cst_78 = arith.constant dense<0.000000e+00> : vector<8x96xf32>
    %306 = tpu.matmul %305, %3, %cst_78 {dimension_numbers = #tpu.dot_dimension_numbers<[1], [0], [0], [1], [0, 0, 1, 1], [], []>} : vector<8x32xbf16>, vector<32x96xbf16>, vector<8x96xf32> -> vector<8x96xf32>
    %307 = vector.extract_strided_slice %304 {offsets = [0, 0], sizes = [8, 32], strides = [1, 1]} : vector<8x96xf32> to vector<8x32xf32>
    %308 = vector.extract_strided_slice %306 {offsets = [0, 0], sizes = [8, 32], strides = [1, 1]} : vector<8x96xf32> to vector<8x32xf32>
    %309 = arith.addf %307, %308 : vector<8x32xf32>
    %310 = arith.negf %309 : vector<8x32xf32>
    %311 = math.exp %310 : vector<8x32xf32>
    %cst_79 = arith.constant 1.000000e+00 : f32
    %312 = vector.broadcast %cst_79 : f32 to vector<8x32xf32>
    %313 = arith.addf %312, %311 : vector<8x32xf32>
    %314 = arith.divf %312, %313 : vector<8x32xf32>
    %315 = vector.extract_strided_slice %304 {offsets = [0, 32], sizes = [8, 32], strides = [1, 1]} : vector<8x96xf32> to vector<8x32xf32>
    %316 = vector.extract_strided_slice %306 {offsets = [0, 32], sizes = [8, 32], strides = [1, 1]} : vector<8x96xf32> to vector<8x32xf32>
    %317 = arith.addf %315, %316 : vector<8x32xf32>
    %318 = arith.negf %317 : vector<8x32xf32>
    %319 = math.exp %318 : vector<8x32xf32>
    %cst_80 = arith.constant 1.000000e+00 : f32
    %320 = vector.broadcast %cst_80 : f32 to vector<8x32xf32>
    %321 = arith.addf %320, %319 : vector<8x32xf32>
    %322 = arith.divf %320, %321 : vector<8x32xf32>
    %323 = vector.extract_strided_slice %304 {offsets = [0, 64], sizes = [8, 32], strides = [1, 1]} : vector<8x96xf32> to vector<8x32xf32>
    %324 = vector.extract_strided_slice %306 {offsets = [0, 64], sizes = [8, 32], strides = [1, 1]} : vector<8x96xf32> to vector<8x32xf32>
    %325 = arith.mulf %314, %324 : vector<8x32xf32>
    %326 = arith.addf %323, %325 : vector<8x32xf32>
    %327 = math.tanh %326 : vector<8x32xf32>
    %328 = arith.subf %297, %327 : vector<8x32xf32>
    %329 = arith.mulf %322, %328 : vector<8x32xf32>
    %330 = arith.addf %327, %329 : vector<8x32xf32>
    %331 = arith.truncf %330 : vector<8x32xf32> to vector<8x32xbf16>
    %c9_81 = arith.constant 9 : index
    %c0_82 = arith.constant 0 : index
    %c0_83 = arith.constant 0 : index
    %332 = vector.load %arg5[%c9_81, %c0_82, %c0_83] : memref<16x8x32xbf16, #tpu.memory_space<vmem>>, vector<1x8x32xbf16>
    %333 = vector.shape_cast %332 : vector<1x8x32xbf16> to vector<8x32xbf16>
    %334 = vector.shape_cast %331 : vector<8x32xbf16> to vector<1x8x32xbf16>
    tpu.vector_store %arg5[%c9_81, %c0_82, %c0_83], %334 {strides = array<i32>} : memref<16x8x32xbf16, #tpu.memory_space<vmem>>, vector<1x8x32xbf16>,
    %c10 = arith.constant 10 : index
    %c0_84 = arith.constant 0 : index
    %c0_85 = arith.constant 0 : index
    %335 = vector.load %arg2[%c10, %c0_84, %c0_85] : memref<16x8x96xbf16, #tpu.memory_space<vmem>>, vector<1x8x96xbf16>
    %336 = vector.shape_cast %335 : vector<1x8x96xbf16> to vector<8x96xbf16>
    %337 = arith.extf %336 : vector<8x96xbf16> to vector<8x96xf32>
    %338 = arith.truncf %330 : vector<8x32xf32> to vector<8x32xbf16>
    %cst_86 = arith.constant dense<0.000000e+00> : vector<8x96xf32>
    %339 = tpu.matmul %338, %3, %cst_86 {dimension_numbers = #tpu.dot_dimension_numbers<[1], [0], [0], [1], [0, 0, 1, 1], [], []>} : vector<8x32xbf16>, vector<32x96xbf16>, vector<8x96xf32> -> vector<8x96xf32>
    %340 = vector.extract_strided_slice %337 {offsets = [0, 0], sizes = [8, 32], strides = [1, 1]} : vector<8x96xf32> to vector<8x32xf32>
    %341 = vector.extract_strided_slice %339 {offsets = [0, 0], sizes = [8, 32], strides = [1, 1]} : vector<8x96xf32> to vector<8x32xf32>
    %342 = arith.addf %340, %341 : vector<8x32xf32>
    %343 = arith.negf %342 : vector<8x32xf32>
    %344 = math.exp %343 : vector<8x32xf32>
    %cst_87 = arith.constant 1.000000e+00 : f32
    %345 = vector.broadcast %cst_87 : f32 to vector<8x32xf32>
    %346 = arith.addf %345, %344 : vector<8x32xf32>
    %347 = arith.divf %345, %346 : vector<8x32xf32>
    %348 = vector.extract_strided_slice %337 {offsets = [0, 32], sizes = [8, 32], strides = [1, 1]} : vector<8x96xf32> to vector<8x32xf32>
    %349 = vector.extract_strided_slice %339 {offsets = [0, 32], sizes = [8, 32], strides = [1, 1]} : vector<8x96xf32> to vector<8x32xf32>
    %350 = arith.addf %348, %349 : vector<8x32xf32>
    %351 = arith.negf %350 : vector<8x32xf32>
    %352 = math.exp %351 : vector<8x32xf32>
    %cst_88 = arith.constant 1.000000e+00 : f32
    %353 = vector.broadcast %cst_88 : f32 to vector<8x32xf32>
    %354 = arith.addf %353, %352 : vector<8x32xf32>
    %355 = arith.divf %353, %354 : vector<8x32xf32>
    %356 = vector.extract_strided_slice %337 {offsets = [0, 64], sizes = [8, 32], strides = [1, 1]} : vector<8x96xf32> to vector<8x32xf32>
    %357 = vector.extract_strided_slice %339 {offsets = [0, 64], sizes = [8, 32], strides = [1, 1]} : vector<8x96xf32> to vector<8x32xf32>
    %358 = arith.mulf %347, %357 : vector<8x32xf32>
    %359 = arith.addf %356, %358 : vector<8x32xf32>
    %360 = math.tanh %359 : vector<8x32xf32>
    %361 = arith.subf %330, %360 : vector<8x32xf32>
    %362 = arith.mulf %355, %361 : vector<8x32xf32>
    %363 = arith.addf %360, %362 : vector<8x32xf32>
    %364 = arith.truncf %363 : vector<8x32xf32> to vector<8x32xbf16>
    %c10_89 = arith.constant 10 : index
    %c0_90 = arith.constant 0 : index
    %c0_91 = arith.constant 0 : index
    %365 = vector.load %arg5[%c10_89, %c0_90, %c0_91] : memref<16x8x32xbf16, #tpu.memory_space<vmem>>, vector<1x8x32xbf16>
    %366 = vector.shape_cast %365 : vector<1x8x32xbf16> to vector<8x32xbf16>
    %367 = vector.shape_cast %364 : vector<8x32xbf16> to vector<1x8x32xbf16>
    tpu.vector_store %arg5[%c10_89, %c0_90, %c0_91], %367 {strides = array<i32>} : memref<16x8x32xbf16, #tpu.memory_space<vmem>>, vector<1x8x32xbf16>,
    %c11 = arith.constant 11 : index
    %c0_92 = arith.constant 0 : index
    %c0_93 = arith.constant 0 : index
    %368 = vector.load %arg2[%c11, %c0_92, %c0_93] : memref<16x8x96xbf16, #tpu.memory_space<vmem>>, vector<1x8x96xbf16>
    %369 = vector.shape_cast %368 : vector<1x8x96xbf16> to vector<8x96xbf16>
    %370 = arith.extf %369 : vector<8x96xbf16> to vector<8x96xf32>
    %371 = arith.truncf %363 : vector<8x32xf32> to vector<8x32xbf16>
    %cst_94 = arith.constant dense<0.000000e+00> : vector<8x96xf32>
    %372 = tpu.matmul %371, %3, %cst_94 {dimension_numbers = #tpu.dot_dimension_numbers<[1], [0], [0], [1], [0, 0, 1, 1], [], []>} : vector<8x32xbf16>, vector<32x96xbf16>, vector<8x96xf32> -> vector<8x96xf32>
    %373 = vector.extract_strided_slice %370 {offsets = [0, 0], sizes = [8, 32], strides = [1, 1]} : vector<8x96xf32> to vector<8x32xf32>
    %374 = vector.extract_strided_slice %372 {offsets = [0, 0], sizes = [8, 32], strides = [1, 1]} : vector<8x96xf32> to vector<8x32xf32>
    %375 = arith.addf %373, %374 : vector<8x32xf32>
    %376 = arith.negf %375 : vector<8x32xf32>
    %377 = math.exp %376 : vector<8x32xf32>
    %cst_95 = arith.constant 1.000000e+00 : f32
    %378 = vector.broadcast %cst_95 : f32 to vector<8x32xf32>
    %379 = arith.addf %378, %377 : vector<8x32xf32>
    %380 = arith.divf %378, %379 : vector<8x32xf32>
    %381 = vector.extract_strided_slice %370 {offsets = [0, 32], sizes = [8, 32], strides = [1, 1]} : vector<8x96xf32> to vector<8x32xf32>
    %382 = vector.extract_strided_slice %372 {offsets = [0, 32], sizes = [8, 32], strides = [1, 1]} : vector<8x96xf32> to vector<8x32xf32>
    %383 = arith.addf %381, %382 : vector<8x32xf32>
    %384 = arith.negf %383 : vector<8x32xf32>
    %385 = math.exp %384 : vector<8x32xf32>
    %cst_96 = arith.constant 1.000000e+00 : f32
    %386 = vector.broadcast %cst_96 : f32 to vector<8x32xf32>
    %387 = arith.addf %386, %385 : vector<8x32xf32>
    %388 = arith.divf %386, %387 : vector<8x32xf32>
    %389 = vector.extract_strided_slice %370 {offsets = [0, 64], sizes = [8, 32], strides = [1, 1]} : vector<8x96xf32> to vector<8x32xf32>
    %390 = vector.extract_strided_slice %372 {offsets = [0, 64], sizes = [8, 32], strides = [1, 1]} : vector<8x96xf32> to vector<8x32xf32>
    %391 = arith.mulf %380, %390 : vector<8x32xf32>
    %392 = arith.addf %389, %391 : vector<8x32xf32>
    %393 = math.tanh %392 : vector<8x32xf32>
    %394 = arith.subf %363, %393 : vector<8x32xf32>
    %395 = arith.mulf %388, %394 : vector<8x32xf32>
    %396 = arith.addf %393, %395 : vector<8x32xf32>
    %397 = arith.truncf %396 : vector<8x32xf32> to vector<8x32xbf16>
    %c11_97 = arith.constant 11 : index
    %c0_98 = arith.constant 0 : index
    %c0_99 = arith.constant 0 : index
    %398 = vector.load %arg5[%c11_97, %c0_98, %c0_99] : memref<16x8x32xbf16, #tpu.memory_space<vmem>>, vector<1x8x32xbf16>
    %399 = vector.shape_cast %398 : vector<1x8x32xbf16> to vector<8x32xbf16>
    %400 = vector.shape_cast %397 : vector<8x32xbf16> to vector<1x8x32xbf16>
    tpu.vector_store %arg5[%c11_97, %c0_98, %c0_99], %400 {strides = array<i32>} : memref<16x8x32xbf16, #tpu.memory_space<vmem>>, vector<1x8x32xbf16>,
    %c12 = arith.constant 12 : index
    %c0_100 = arith.constant 0 : index
    %c0_101 = arith.constant 0 : index
    %401 = vector.load %arg2[%c12, %c0_100, %c0_101] : memref<16x8x96xbf16, #tpu.memory_space<vmem>>, vector<1x8x96xbf16>
    %402 = vector.shape_cast %401 : vector<1x8x96xbf16> to vector<8x96xbf16>
    %403 = arith.extf %402 : vector<8x96xbf16> to vector<8x96xf32>
    %404 = arith.truncf %396 : vector<8x32xf32> to vector<8x32xbf16>
    %cst_102 = arith.constant dense<0.000000e+00> : vector<8x96xf32>
    %405 = tpu.matmul %404, %3, %cst_102 {dimension_numbers = #tpu.dot_dimension_numbers<[1], [0], [0], [1], [0, 0, 1, 1], [], []>} : vector<8x32xbf16>, vector<32x96xbf16>, vector<8x96xf32> -> vector<8x96xf32>
    %406 = vector.extract_strided_slice %403 {offsets = [0, 0], sizes = [8, 32], strides = [1, 1]} : vector<8x96xf32> to vector<8x32xf32>
    %407 = vector.extract_strided_slice %405 {offsets = [0, 0], sizes = [8, 32], strides = [1, 1]} : vector<8x96xf32> to vector<8x32xf32>
    %408 = arith.addf %406, %407 : vector<8x32xf32>
    %409 = arith.negf %408 : vector<8x32xf32>
    %410 = math.exp %409 : vector<8x32xf32>
    %cst_103 = arith.constant 1.000000e+00 : f32
    %411 = vector.broadcast %cst_103 : f32 to vector<8x32xf32>
    %412 = arith.addf %411, %410 : vector<8x32xf32>
    %413 = arith.divf %411, %412 : vector<8x32xf32>
    %414 = vector.extract_strided_slice %403 {offsets = [0, 32], sizes = [8, 32], strides = [1, 1]} : vector<8x96xf32> to vector<8x32xf32>
    %415 = vector.extract_strided_slice %405 {offsets = [0, 32], sizes = [8, 32], strides = [1, 1]} : vector<8x96xf32> to vector<8x32xf32>
    %416 = arith.addf %414, %415 : vector<8x32xf32>
    %417 = arith.negf %416 : vector<8x32xf32>
    %418 = math.exp %417 : vector<8x32xf32>
    %cst_104 = arith.constant 1.000000e+00 : f32
    %419 = vector.broadcast %cst_104 : f32 to vector<8x32xf32>
    %420 = arith.addf %419, %418 : vector<8x32xf32>
    %421 = arith.divf %419, %420 : vector<8x32xf32>
    %422 = vector.extract_strided_slice %403 {offsets = [0, 64], sizes = [8, 32], strides = [1, 1]} : vector<8x96xf32> to vector<8x32xf32>
    %423 = vector.extract_strided_slice %405 {offsets = [0, 64], sizes = [8, 32], strides = [1, 1]} : vector<8x96xf32> to vector<8x32xf32>
    %424 = arith.mulf %413, %423 : vector<8x32xf32>
    %425 = arith.addf %422, %424 : vector<8x32xf32>
    %426 = math.tanh %425 : vector<8x32xf32>
    %427 = arith.subf %396, %426 : vector<8x32xf32>
    %428 = arith.mulf %421, %427 : vector<8x32xf32>
    %429 = arith.addf %426, %428 : vector<8x32xf32>
    %430 = arith.truncf %429 : vector<8x32xf32> to vector<8x32xbf16>
    %c12_105 = arith.constant 12 : index
    %c0_106 = arith.constant 0 : index
    %c0_107 = arith.constant 0 : index
    %431 = vector.load %arg5[%c12_105, %c0_106, %c0_107] : memref<16x8x32xbf16, #tpu.memory_space<vmem>>, vector<1x8x32xbf16>
    %432 = vector.shape_cast %431 : vector<1x8x32xbf16> to vector<8x32xbf16>
    %433 = vector.shape_cast %430 : vector<8x32xbf16> to vector<1x8x32xbf16>
    tpu.vector_store %arg5[%c12_105, %c0_106, %c0_107], %433 {strides = array<i32>} : memref<16x8x32xbf16, #tpu.memory_space<vmem>>, vector<1x8x32xbf16>,
    %c13 = arith.constant 13 : index
    %c0_108 = arith.constant 0 : index
    %c0_109 = arith.constant 0 : index
    %434 = vector.load %arg2[%c13, %c0_108, %c0_109] : memref<16x8x96xbf16, #tpu.memory_space<vmem>>, vector<1x8x96xbf16>
    %435 = vector.shape_cast %434 : vector<1x8x96xbf16> to vector<8x96xbf16>
    %436 = arith.extf %435 : vector<8x96xbf16> to vector<8x96xf32>
    %437 = arith.truncf %429 : vector<8x32xf32> to vector<8x32xbf16>
    %cst_110 = arith.constant dense<0.000000e+00> : vector<8x96xf32>
    %438 = tpu.matmul %437, %3, %cst_110 {dimension_numbers = #tpu.dot_dimension_numbers<[1], [0], [0], [1], [0, 0, 1, 1], [], []>} : vector<8x32xbf16>, vector<32x96xbf16>, vector<8x96xf32> -> vector<8x96xf32>
    %439 = vector.extract_strided_slice %436 {offsets = [0, 0], sizes = [8, 32], strides = [1, 1]} : vector<8x96xf32> to vector<8x32xf32>
    %440 = vector.extract_strided_slice %438 {offsets = [0, 0], sizes = [8, 32], strides = [1, 1]} : vector<8x96xf32> to vector<8x32xf32>
    %441 = arith.addf %439, %440 : vector<8x32xf32>
    %442 = arith.negf %441 : vector<8x32xf32>
    %443 = math.exp %442 : vector<8x32xf32>
    %cst_111 = arith.constant 1.000000e+00 : f32
    %444 = vector.broadcast %cst_111 : f32 to vector<8x32xf32>
    %445 = arith.addf %444, %443 : vector<8x32xf32>
    %446 = arith.divf %444, %445 : vector<8x32xf32>
    %447 = vector.extract_strided_slice %436 {offsets = [0, 32], sizes = [8, 32], strides = [1, 1]} : vector<8x96xf32> to vector<8x32xf32>
    %448 = vector.extract_strided_slice %438 {offsets = [0, 32], sizes = [8, 32], strides = [1, 1]} : vector<8x96xf32> to vector<8x32xf32>
    %449 = arith.addf %447, %448 : vector<8x32xf32>
    %450 = arith.negf %449 : vector<8x32xf32>
    %451 = math.exp %450 : vector<8x32xf32>
    %cst_112 = arith.constant 1.000000e+00 : f32
    %452 = vector.broadcast %cst_112 : f32 to vector<8x32xf32>
    %453 = arith.addf %452, %451 : vector<8x32xf32>
    %454 = arith.divf %452, %453 : vector<8x32xf32>
    %455 = vector.extract_strided_slice %436 {offsets = [0, 64], sizes = [8, 32], strides = [1, 1]} : vector<8x96xf32> to vector<8x32xf32>
    %456 = vector.extract_strided_slice %438 {offsets = [0, 64], sizes = [8, 32], strides = [1, 1]} : vector<8x96xf32> to vector<8x32xf32>
    %457 = arith.mulf %446, %456 : vector<8x32xf32>
    %458 = arith.addf %455, %457 : vector<8x32xf32>
    %459 = math.tanh %458 : vector<8x32xf32>
    %460 = arith.subf %429, %459 : vector<8x32xf32>
    %461 = arith.mulf %454, %460 : vector<8x32xf32>
    %462 = arith.addf %459, %461 : vector<8x32xf32>
    %463 = arith.truncf %462 : vector<8x32xf32> to vector<8x32xbf16>
    %c13_113 = arith.constant 13 : index
    %c0_114 = arith.constant 0 : index
    %c0_115 = arith.constant 0 : index
    %464 = vector.load %arg5[%c13_113, %c0_114, %c0_115] : memref<16x8x32xbf16, #tpu.memory_space<vmem>>, vector<1x8x32xbf16>
    %465 = vector.shape_cast %464 : vector<1x8x32xbf16> to vector<8x32xbf16>
    %466 = vector.shape_cast %463 : vector<8x32xbf16> to vector<1x8x32xbf16>
    tpu.vector_store %arg5[%c13_113, %c0_114, %c0_115], %466 {strides = array<i32>} : memref<16x8x32xbf16, #tpu.memory_space<vmem>>, vector<1x8x32xbf16>,
    %c14 = arith.constant 14 : index
    %c0_116 = arith.constant 0 : index
    %c0_117 = arith.constant 0 : index
    %467 = vector.load %arg2[%c14, %c0_116, %c0_117] : memref<16x8x96xbf16, #tpu.memory_space<vmem>>, vector<1x8x96xbf16>
    %468 = vector.shape_cast %467 : vector<1x8x96xbf16> to vector<8x96xbf16>
    %469 = arith.extf %468 : vector<8x96xbf16> to vector<8x96xf32>
    %470 = arith.truncf %462 : vector<8x32xf32> to vector<8x32xbf16>
    %cst_118 = arith.constant dense<0.000000e+00> : vector<8x96xf32>
    %471 = tpu.matmul %470, %3, %cst_118 {dimension_numbers = #tpu.dot_dimension_numbers<[1], [0], [0], [1], [0, 0, 1, 1], [], []>} : vector<8x32xbf16>, vector<32x96xbf16>, vector<8x96xf32> -> vector<8x96xf32>
    %472 = vector.extract_strided_slice %469 {offsets = [0, 0], sizes = [8, 32], strides = [1, 1]} : vector<8x96xf32> to vector<8x32xf32>
    %473 = vector.extract_strided_slice %471 {offsets = [0, 0], sizes = [8, 32], strides = [1, 1]} : vector<8x96xf32> to vector<8x32xf32>
    %474 = arith.addf %472, %473 : vector<8x32xf32>
    %475 = arith.negf %474 : vector<8x32xf32>
    %476 = math.exp %475 : vector<8x32xf32>
    %cst_119 = arith.constant 1.000000e+00 : f32
    %477 = vector.broadcast %cst_119 : f32 to vector<8x32xf32>
    %478 = arith.addf %477, %476 : vector<8x32xf32>
    %479 = arith.divf %477, %478 : vector<8x32xf32>
    %480 = vector.extract_strided_slice %469 {offsets = [0, 32], sizes = [8, 32], strides = [1, 1]} : vector<8x96xf32> to vector<8x32xf32>
    %481 = vector.extract_strided_slice %471 {offsets = [0, 32], sizes = [8, 32], strides = [1, 1]} : vector<8x96xf32> to vector<8x32xf32>
    %482 = arith.addf %480, %481 : vector<8x32xf32>
    %483 = arith.negf %482 : vector<8x32xf32>
    %484 = math.exp %483 : vector<8x32xf32>
    %cst_120 = arith.constant 1.000000e+00 : f32
    %485 = vector.broadcast %cst_120 : f32 to vector<8x32xf32>
    %486 = arith.addf %485, %484 : vector<8x32xf32>
    %487 = arith.divf %485, %486 : vector<8x32xf32>
    %488 = vector.extract_strided_slice %469 {offsets = [0, 64], sizes = [8, 32], strides = [1, 1]} : vector<8x96xf32> to vector<8x32xf32>
    %489 = vector.extract_strided_slice %471 {offsets = [0, 64], sizes = [8, 32], strides = [1, 1]} : vector<8x96xf32> to vector<8x32xf32>
    %490 = arith.mulf %479, %489 : vector<8x32xf32>
    %491 = arith.addf %488, %490 : vector<8x32xf32>
    %492 = math.tanh %491 : vector<8x32xf32>
    %493 = arith.subf %462, %492 : vector<8x32xf32>
    %494 = arith.mulf %487, %493 : vector<8x32xf32>
    %495 = arith.addf %492, %494 : vector<8x32xf32>
    %496 = arith.truncf %495 : vector<8x32xf32> to vector<8x32xbf16>
    %c14_121 = arith.constant 14 : index
    %c0_122 = arith.constant 0 : index
    %c0_123 = arith.constant 0 : index
    %497 = vector.load %arg5[%c14_121, %c0_122, %c0_123] : memref<16x8x32xbf16, #tpu.memory_space<vmem>>, vector<1x8x32xbf16>
    %498 = vector.shape_cast %497 : vector<1x8x32xbf16> to vector<8x32xbf16>
    %499 = vector.shape_cast %496 : vector<8x32xbf16> to vector<1x8x32xbf16>
    tpu.vector_store %arg5[%c14_121, %c0_122, %c0_123], %499 {strides = array<i32>} : memref<16x8x32xbf16, #tpu.memory_space<vmem>>, vector<1x8x32xbf16>,
    %c15 = arith.constant 15 : index
    %c0_124 = arith.constant 0 : index
    %c0_125 = arith.constant 0 : index
    %500 = vector.load %arg2[%c15, %c0_124, %c0_125] : memref<16x8x96xbf16, #tpu.memory_space<vmem>>, vector<1x8x96xbf16>
    %501 = vector.shape_cast %500 : vector<1x8x96xbf16> to vector<8x96xbf16>
    %502 = arith.extf %501 : vector<8x96xbf16> to vector<8x96xf32>
    %503 = arith.truncf %495 : vector<8x32xf32> to vector<8x32xbf16>
    %cst_126 = arith.constant dense<0.000000e+00> : vector<8x96xf32>
    %504 = tpu.matmul %503, %3, %cst_126 {dimension_numbers = #tpu.dot_dimension_numbers<[1], [0], [0], [1], [0, 0, 1, 1], [], []>} : vector<8x32xbf16>, vector<32x96xbf16>, vector<8x96xf32> -> vector<8x96xf32>
    %505 = vector.extract_strided_slice %502 {offsets = [0, 0], sizes = [8, 32], strides = [1, 1]} : vector<8x96xf32> to vector<8x32xf32>
    %506 = vector.extract_strided_slice %504 {offsets = [0, 0], sizes = [8, 32], strides = [1, 1]} : vector<8x96xf32> to vector<8x32xf32>
    %507 = arith.addf %505, %506 : vector<8x32xf32>
    %508 = arith.negf %507 : vector<8x32xf32>
    %509 = math.exp %508 : vector<8x32xf32>
    %cst_127 = arith.constant 1.000000e+00 : f32
    %510 = vector.broadcast %cst_127 : f32 to vector<8x32xf32>
    %511 = arith.addf %510, %509 : vector<8x32xf32>
    %512 = arith.divf %510, %511 : vector<8x32xf32>
    %513 = vector.extract_strided_slice %502 {offsets = [0, 32], sizes = [8, 32], strides = [1, 1]} : vector<8x96xf32> to vector<8x32xf32>
    %514 = vector.extract_strided_slice %504 {offsets = [0, 32], sizes = [8, 32], strides = [1, 1]} : vector<8x96xf32> to vector<8x32xf32>
    %515 = arith.addf %513, %514 : vector<8x32xf32>
    %516 = arith.negf %515 : vector<8x32xf32>
    %517 = math.exp %516 : vector<8x32xf32>
    %cst_128 = arith.constant 1.000000e+00 : f32
    %518 = vector.broadcast %cst_128 : f32 to vector<8x32xf32>
    %519 = arith.addf %518, %517 : vector<8x32xf32>
    %520 = arith.divf %518, %519 : vector<8x32xf32>
    %521 = vector.extract_strided_slice %502 {offsets = [0, 64], sizes = [8, 32], strides = [1, 1]} : vector<8x96xf32> to vector<8x32xf32>
    %522 = vector.extract_strided_slice %504 {offsets = [0, 64], sizes = [8, 32], strides = [1, 1]} : vector<8x96xf32> to vector<8x32xf32>
    %523 = arith.mulf %512, %522 : vector<8x32xf32>
    %524 = arith.addf %521, %523 : vector<8x32xf32>
    %525 = math.tanh %524 : vector<8x32xf32>
    %526 = arith.subf %495, %525 : vector<8x32xf32>
    %527 = arith.mulf %520, %526 : vector<8x32xf32>
    %528 = arith.addf %525, %527 : vector<8x32xf32>
    %529 = arith.truncf %528 : vector<8x32xf32> to vector<8x32xbf16>
    %c15_129 = arith.constant 15 : index
    %c0_130 = arith.constant 0 : index
    %c0_131 = arith.constant 0 : index
    %530 = vector.load %arg5[%c15_129, %c0_130, %c0_131] : memref<16x8x32xbf16, #tpu.memory_space<vmem>>, vector<1x8x32xbf16>
    %531 = vector.shape_cast %530 : vector<1x8x32xbf16> to vector<8x32xbf16>
    %532 = vector.shape_cast %529 : vector<8x32xbf16> to vector<1x8x32xbf16>
    tpu.vector_store %arg5[%c15_129, %c0_130, %c0_131], %532 {strides = array<i32>} : memref<16x8x32xbf16, #tpu.memory_space<vmem>>, vector<1x8x32xbf16>,
    %c0_132 = arith.constant 0 : index
    %c0_133 = arith.constant 0 : index
    %533 = vector.load %arg7[%c0_132, %c0_133] : memref<8x32xf32, #tpu.memory_space<vmem>>, vector<8x32xf32>
    tpu.vector_store %arg7[%c0_132, %c0_133], %528 {strides = array<i32>} : memref<8x32xf32, #tpu.memory_space<vmem>>, vector<8x32xf32>,
    %c1_i32 = arith.constant 1 : i32
    %534 = arith.cmpi eq, %arg1, %c1_i32 : i32
    %535 = arith.extui %534 : i1 to i32
    %c0_i32_134 = arith.constant 0 : i32
    %536 = arith.cmpi ne, %535, %c0_i32_134 : i32
    scf.if %536 {
      %c0_135 = arith.constant 0 : index
      %c0_136 = arith.constant 0 : index
      %537 = vector.load %arg6[%c0_135, %c0_136] : memref<8x32xf32, #tpu.memory_space<vmem>>, vector<8x32xf32>
      tpu.vector_store %arg6[%c0_135, %c0_136], %528 {strides = array<i32>} : memref<8x32xf32, #tpu.memory_space<vmem>>, vector<8x32xf32>,
    } else {
    }
    return
  }
  func.func @transform_0(%arg0: i32, %arg1: i32) -> (i32, i32, i32) {
    %c0_i32 = arith.constant 0 : i32
    %c0_i32_0 = arith.constant 0 : i32
    return %arg1, %arg0, %c0_i32 : i32, i32, i32
  }
  func.func @transform_1(%arg0: i32, %arg1: i32) -> (i32, i32) {
    %c0_i32 = arith.constant 0 : i32
    %c0_i32_0 = arith.constant 0 : i32
    return %arg0, %c0_i32 : i32, i32
  }
  func.func @transform_2(%arg0: i32, %arg1: i32) -> (i32, i32) {
    %c0_i32 = arith.constant 0 : i32
    %c0_i32_0 = arith.constant 0 : i32
    %c0_i32_1 = arith.constant 0 : i32
    return %c0_i32, %c0_i32_0 : i32, i32
  }
  func.func @transform_3(%arg0: i32, %arg1: i32) -> (i32, i32, i32) {
    %c0_i32 = arith.constant 0 : i32
    %c0_i32_0 = arith.constant 0 : i32
    return %arg1, %arg0, %c0_i32 : i32, i32, i32
  }
  func.func @transform_4(%arg0: i32, %arg1: i32) -> (i32, i32) {
    %c0_i32 = arith.constant 0 : i32
    %c0_i32_0 = arith.constant 0 : i32
    return %arg0, %c0_i32 : i32, i32
  }
}

module attributes {stable_mosaic.version = 11 : i64} {
  func.func @_input_proj_kernel(%arg0: i32, %arg1: memref<256x32xbf16, #tpu.memory_space<vmem>>, %arg2: memref<32x96xbf16, #tpu.memory_space<vmem>>, %arg3: memref<1x96xf32, #tpu.memory_space<vmem>>, %arg4: memref<256x96xbf16, #tpu.memory_space<vmem>>) attributes {dimension_semantics = [#tpu.dimension_semantics<parallel>], iteration_bounds = array<i64: 1>, scalar_prefetch = 0 : i64, scratch_operands = 0 : i64, tpu.core_type = #tpu.core_type<tc>, window_params = [{transform_indices = @transform_0, window_bounds = array<i64: 256, 32>}, {pipeline_mode = #tpu.pipeline_mode<synchronous>, transform_indices = @transform_1, window_bounds = array<i64: 32, 96>}, {pipeline_mode = #tpu.pipeline_mode<synchronous>, transform_indices = @transform_2, window_bounds = array<i64: 1, 96>}, {transform_indices = @transform_3, window_bounds = array<i64: 256, 96>}]} {
    %c0 = arith.constant 0 : index
    %c0_0 = arith.constant 0 : index
    %0 = vector.load %arg1[%c0, %c0_0] : memref<256x32xbf16, #tpu.memory_space<vmem>>, vector<256x32xbf16>
    %c0_1 = arith.constant 0 : index
    %c0_2 = arith.constant 0 : index
    %1 = vector.load %arg2[%c0_1, %c0_2] : memref<32x96xbf16, #tpu.memory_space<vmem>>, vector<32x96xbf16>
    %cst = arith.constant dense<0.000000e+00> : vector<256x96xf32>
    %2 = tpu.matmul %0, %1, %cst {dimension_numbers = #tpu.dot_dimension_numbers<[1], [0], [0], [1], [0, 0, 1, 1], [], []>} : vector<256x32xbf16>, vector<32x96xbf16>, vector<256x96xf32> -> vector<256x96xf32>
    %c0_3 = arith.constant 0 : index
    %c0_4 = arith.constant 0 : index
    %3 = vector.load %arg3[%c0_3, %c0_4] : memref<1x96xf32, #tpu.memory_space<vmem>>, vector<1x96xf32>
    %4 = vector.broadcast %3 : vector<1x96xf32> to vector<256x96xf32>
    %5 = arith.addf %2, %4 : vector<256x96xf32>
    %6 = arith.truncf %5 : vector<256x96xf32> to vector<256x96xbf16>
    %c0_5 = arith.constant 0 : index
    %c0_6 = arith.constant 0 : index
    %7 = vector.load %arg4[%c0_5, %c0_6] : memref<256x96xbf16, #tpu.memory_space<vmem>>, vector<256x96xbf16>
    tpu.vector_store %arg4[%c0_5, %c0_6], %6 {strides = array<i32>} : memref<256x96xbf16, #tpu.memory_space<vmem>>, vector<256x96xbf16>,
    return
  }
  func.func @transform_0(%arg0: i32) -> (i32, i32) {
    %c0_i32 = arith.constant 0 : i32
    %c0_i32_0 = arith.constant 0 : i32
    return %arg0, %c0_i32 : i32, i32
  }
  func.func @transform_1(%arg0: i32) -> (i32, i32) {
    %c0_i32 = arith.constant 0 : i32
    %c0_i32_0 = arith.constant 0 : i32
    %c0_i32_1 = arith.constant 0 : i32
    return %c0_i32, %c0_i32_0 : i32, i32
  }
  func.func @transform_2(%arg0: i32) -> (i32, i32) {
    %c0_i32 = arith.constant 0 : i32
    %c0_i32_0 = arith.constant 0 : i32
    %c0_i32_1 = arith.constant 0 : i32
    return %c0_i32, %c0_i32_0 : i32, i32
  }
  func.func @transform_3(%arg0: i32) -> (i32, i32) {
    %c0_i32 = arith.constant 0 : i32
    %c0_i32_0 = arith.constant 0 : i32
    return %arg0, %c0_i32 : i32, i32
  }
}

</mosaic_0001>

<bundles_post_ra>
// kernel: abstract_gru_forward.2
= control target key start
LH: loop header
LB: loop body
LE: loop exit
PB: predicated region body
PF: predicated region fallthrough
CT: control target
= control target key end

     0   :  { %vm150_vm0 = vcmask 261120   ;;  %vm488_vm1 = vcmask 781312   ;;  %s955_s1 = inlined_call_operand.vmem [shape: bf16[32,96], index: 1, kind: input, shape index: {}]   ;;  %s956_s0 = inlined_call_operand.vmem [shape: bf16[256,32], index: 0, kind: input, shape index: {}]   ;;  %s957_s2 = inlined_call_operand.vmem [shape: f32[1,96], index: 2, kind: input, shape index: {}]   ;;  %s958_s3 = inlined_call_operand.vmem [shape: bf16[256,96], index: 3, kind: output, shape index: {}]  }
   0x1   :  { %v682_v0 = vld [vmem:[%s955_s1] sm:$0xff]   ;;  %v683_v1 = vld [vmem:[%s955_s1 + $0x8] sm:$0xff]   ;;  %v688_v6 = vld [vmem:[%s956_s0 + $0x10] sm:$0xff]  }
   0x2   :  { %642 = vmatprep.subr.bf16.mxu0 %v682_v0  ;;  %678 = vmatprep.subr.bf16.mxu1 %v682_v0  ;;  %v684_v2 = vld [vmem:[%s956_s0] sm:$0xff]   ;;  %v686_v4 = vld [vmem:[%s956_s0 + $0x8] sm:$0xff]   ;;  %v689_v7 = vld [vmem:[%s956_s0 + $0x50] sm:$0xff]  }
   0x3   :  { %643 = vmatpush3.bf16.msra.mxu0 %v682_v0  ;;  %680 = vmatpush3.bf16.msra.mxu1 %v682_v0  ;;  %v685_v3 = vld [vmem:[%s956_s0 + $0x40] sm:$0xff]   ;;  %v687_v5 = vld [vmem:[%s956_s0 + $0x48] sm:$0xff]   ;;  %v690_v8 = vld [vmem:[%s956_s0 + $0x18] sm:$0xff]  }
   0x4   :  { %644 = vmatprep.subr.bf16.mxu0 %v683_v1  ;;  %679 = vmatprep.subr.bf16.mxu1 %v683_v1  ;;  %v691_v9 = vld [vmem:[%s956_s0 + $0x58] sm:$0xff]   ;;  %v692_v10 = vld [vmem:[%s956_s0 + $0x20] sm:$0xff]   ;;  %v694_v12 = vld [vmem:[%s956_s0 + $0x28] sm:$0xff]  }
   0x5   :  { %646 = vmatprep.mubr.msk.bf16.mxu0 %vm150_vm0, %v684_v2  ;;  %662 = vmatprep.mubr.msk.bf16.mxu1 %vm150_vm0, %v685_v3  ;;  %v693_v11 = vld [vmem:[%s956_s0 + $0x60] sm:$0xff]   ;;  %v695_v13 = vld [vmem:[%s956_s0 + $0x68] sm:$0xff]   ;;  %v696_v14 = vld [vmem:[%s956_s0 + $0x30] sm:$0xff]  }
   0x6   :  { %v697_v15 = vld [vmem:[%s956_s0 + $0x70] sm:$0xff]   ;;  %v698_v16 = vld [vmem:[%s956_s0 + $0x38] sm:$0xff]   ;;  %v793_v18 = vld [vmem:[%s957_s2] ss:$0 sm:$0xff] }
   0x7   :  { %645 = vmatpush3.bf16.msra.mxu0 %v683_v1  ;;  %681 = vmatpush3.bf16.msra.mxu1 %v683_v1  ;;  %v699_v17 = vld [vmem:[%s956_s0 + $0x78] sm:$0xff]  }
   0xa   :  { %647 = vmatmul.mubr.msk.bf16.vlgmr.msra.gmra.mrb[0].mxu0 %vm150_vm0, %v686_v4  ;;  %663 = vmatmul.mubr.msk.bf16.vlgmr.msra.gmra.mrb[0].mxu1 %vm150_vm0, %v687_v5 }
   0xb   :  { %650 = vmatprep.mubr.msk.bf16.mxu0 %vm150_vm0, %v688_v6  ;;  %666 = vmatprep.mubr.msk.bf16.mxu1 %vm150_vm0, %v689_v7 }
  0x12   :  { %651 = vmatmul.mubr.msk.bf16.gmra.mrb[4].mxu0 %vm150_vm0, %v690_v8  ;;  %667 = vmatmul.mubr.msk.bf16.gmra.mrb[4].mxu1 %vm150_vm0, %v691_v9 }
  0x13   :  { %654 = vmatprep.mubr.msk.bf16.mxu0 %vm150_vm0, %v692_v10  ;;  %670 = vmatprep.mubr.msk.bf16.mxu1 %vm150_vm0, %v693_v11 }
  0x1a   :  { %655 = vmatmul.mubr.msk.bf16.gmra.mrb[8].mxu0 %vm150_vm0, %v694_v12  ;;  %671 = vmatmul.mubr.msk.bf16.gmra.mrb[8].mxu1 %vm150_vm0, %v695_v13 }
  0x1b   :  { %658 = vmatprep.mubr.msk.bf16.mxu0 %vm150_vm0, %v696_v14  ;;  %674 = vmatprep.mubr.msk.bf16.mxu1 %vm150_vm0, %v697_v15 }
  0x22   :  { %659 = vmatmul.mubr.msk.bf16.gmra.mrb[12].mxu0 %vm150_vm0, %v698_v16  ;;  %675 = vmatmul.mubr.msk.bf16.gmra.mrb[12].mxu1 %vm150_vm0, %v699_v17 }
  0xdd   :  { %v648_v19 = vpop.f32.mrb[0].mxu0  ;;  %v664_v20 = vpop.f32.mrb[0].mxu1 }
  0xde   :  { %v242_v21 = vadd.f32 %v648_v19, %v793_v18  ;;  %v306_v22 = vadd.f32 %v664_v20, %v793_v18  ;;  %v233_v23 = vpop.f32.mrb[1].mxu0  ;;  %v297_v24 = vpop.f32.mrb[1].mxu1 }
  0xdf   :  { %v234_v25 = vadd.f32 %v793_v18, %v233_v23  ;;  %v298_v26 = vadd.f32 %v793_v18, %v297_v24  ;;  %v649_v27 = vpop.f32.mrb[2].mxu0  ;;  %v665_v28 = vpop.f32.mrb[2].mxu1 }
  0xe0   :  { %v594_v29 = vpack.c.bf16 %v242_v21, %v242_v21  ;;  %v610_v30 = vpack.c.bf16 %v306_v22, %v306_v22  ;;  %v245_v31 = vadd.f32 %v649_v27, %v793_v18  ;;  %v309_v32 = vadd.f32 %v665_v28, %v793_v18  ;;  %v236_v33 = vpop.f32.mrb[3].mxu0  ;;  %v300_v34 = vpop.f32.mrb[3].mxu1 }
  0xe1   :  { %v592_v35 = vpack.c.bf16 %v234_v25, %v234_v25  ;;  %v608_v36 = vpack.c.bf16 %v298_v26, %v298_v26  ;;  %v237_v37 = vadd.f32 %v793_v18, %v236_v33  ;;  %v301_v38 = vadd.f32 %v793_v18, %v300_v34 }
  0xe2   :  { %491 = vst.msk [vmem:[%s958_s3 + $0x8] sm:$0xf] %vm488_vm1, %v594_v29  ;;  %507 = vst.msk [vmem:[%s958_s3 + $0x48] sm:$0xf] %vm488_vm1, %v610_v30  ;;  %v595_v39 = vpack.c.bf16 %v245_v31, %v245_v31  ;;  %v611_v40 = vpack.c.bf16 %v309_v32, %v309_v32 }
  0xe3   :  { %489 = vst.msk [vmem:[%s958_s3] sm:$0xf] %vm488_vm1, %v592_v35  ;;  %505 = vst.msk [vmem:[%s958_s3 + $0x40] sm:$0xf] %vm488_vm1, %v608_v36  ;;  %v593_v41 = vpack.c.bf16 %v237_v37, %v237_v37  ;;  %v609_v42 = vpack.c.bf16 %v301_v38, %v301_v38 }
  0xe4   :  { %492 = vst.msk [vmem:[%s958_s3 + $0xc] sm:$0xf] %vm488_vm1, %v595_v39  ;;  %508 = vst.msk [vmem:[%s958_s3 + $0x4c] sm:$0xf] %vm488_vm1, %v611_v40 }
  0xe5   :  { %490 = vst.msk [vmem:[%s958_s3 + $0x4] sm:$0xf] %vm488_vm1, %v593_v41  ;;  %506 = vst.msk [vmem:[%s958_s3 + $0x44] sm:$0xf] %vm488_vm1, %v609_v42  ;;  %v652_v43 = vpop.f32.mrb[4].mxu0  ;;  %v668_v44 = vpop.f32.mrb[4].mxu1 }
  0xe6   :  { %v258_v45 = vadd.f32 %v652_v43, %v793_v18  ;;  %v322_v46 = vadd.f32 %v668_v44, %v793_v18  ;;  %v249_v47 = vpop.f32.mrb[5].mxu0  ;;  %v313_v48 = vpop.f32.mrb[5].mxu1 }
  0xe7   :  { %v250_v49 = vadd.f32 %v793_v18, %v249_v47  ;;  %v314_v50 = vadd.f32 %v793_v18, %v313_v48  ;;  %v653_v51 = vpop.f32.mrb[6].mxu0  ;;  %v669_v52 = vpop.f32.mrb[6].mxu1 }
  0xe8   :  { %v598_v53 = vpack.c.bf16 %v258_v45, %v258_v45  ;;  %v614_v54 = vpack.c.bf16 %v322_v46, %v322_v46  ;;  %v261_v55 = vadd.f32 %v653_v51, %v793_v18  ;;  %v325_v56 = vadd.f32 %v669_v52, %v793_v18  ;;  %v252_v57 = vpop.f32.mrb[7].mxu0  ;;  %v316_v58 = vpop.f32.mrb[7].mxu1 }
  0xe9   :  { %v596_v59 = vpack.c.bf16 %v250_v49, %v250_v49  ;;  %v612_v60 = vpack.c.bf16 %v314_v50, %v314_v50  ;;  %v253_v61 = vadd.f32 %v793_v18, %v252_v57  ;;  %v317_v62 = vadd.f32 %v793_v18, %v316_v58 }
  0xea   :  { %495 = vst.msk [vmem:[%s958_s3 + $0x18] sm:$0xf] %vm488_vm1, %v598_v53  ;;  %511 = vst.msk [vmem:[%s958_s3 + $0x58] sm:$0xf] %vm488_vm1, %v614_v54  ;;  %v599_v63 = vpack.c.bf16 %v261_v55, %v261_v55  ;;  %v615_v0 = vpack.c.bf16 %v325_v56, %v325_v56 }
  0xeb   :  { %493 = vst.msk [vmem:[%s958_s3 + $0x10] sm:$0xf] %vm488_vm1, %v596_v59  ;;  %509 = vst.msk [vmem:[%s958_s3 + $0x50] sm:$0xf] %vm488_vm1, %v612_v60  ;;  %v597_v1 = vpack.c.bf16 %v253_v61, %v253_v61  ;;  %v613_v2 = vpack.c.bf16 %v317_v62, %v317_v62 }
  0xec   :  { %496 = vst.msk [vmem:[%s958_s3 + $0x1c] sm:$0xf] %vm488_vm1, %v599_v63  ;;  %512 = vst.msk [vmem:[%s958_s3 + $0x5c] sm:$0xf] %vm488_vm1, %v615_v0 }
  0xed   :  { %494 = vst.msk [vmem:[%s958_s3 + $0x14] sm:$0xf] %vm488_vm1, %v597_v1  ;;  %510 = vst.msk [vmem:[%s958_s3 + $0x54] sm:$0xf] %vm488_vm1, %v613_v2  ;;  %v656_v3 = vpop.f32.mrb[8].mxu0  ;;  %v672_v4 = vpop.f32.mrb[8].mxu1 }
  0xee   :  { %v274_v5 = vadd.f32 %v656_v3, %v793_v18  ;;  %v338_v6 = vadd.f32 %v672_v4, %v793_v18  ;;  %v265_v7 = vpop.f32.mrb[9].mxu0  ;;  %v329_v8 = vpop.f32.mrb[9].mxu1 }
  0xef   :  { %v266_v9 = vadd.f32 %v793_v18, %v265_v7  ;;  %v330_v10 = vadd.f32 %v793_v18, %v329_v8  ;;  %v657_v11 = vpop.f32.mrb[10].mxu0  ;;  %v673_v12 = vpop.f32.mrb[10].mxu1 }
  0xf0   :  { %v602_v13 = vpack.c.bf16 %v274_v5, %v274_v5  ;;  %v618_v14 = vpack.c.bf16 %v338_v6, %v338_v6  ;;  %v277_v15 = vadd.f32 %v657_v11, %v793_v18  ;;  %v341_v16 = vadd.f32 %v673_v12, %v793_v18  ;;  %v268_v17 = vpop.f32.mrb[11].mxu0  ;;  %v332_v19 = vpop.f32.mrb[11].mxu1 }
  0xf1   :  { %v600_v20 = vpack.c.bf16 %v266_v9, %v266_v9  ;;  %v616_v21 = vpack.c.bf16 %v330_v10, %v330_v10  ;;  %v269_v22 = vadd.f32 %v793_v18, %v268_v17  ;;  %v333_v23 = vadd.f32 %v793_v18, %v332_v19 }
  0xf2   :  { %499 = vst.msk [vmem:[%s958_s3 + $0x28] sm:$0xf] %vm488_vm1, %v602_v13  ;;  %515 = vst.msk [vmem:[%s958_s3 + $0x68] sm:$0xf] %vm488_vm1, %v618_v14  ;;  %v603_v24 = vpack.c.bf16 %v277_v15, %v277_v15  ;;  %v619_v25 = vpack.c.bf16 %v341_v16, %v341_v16 }
  0xf3   :  { %497 = vst.msk [vmem:[%s958_s3 + $0x20] sm:$0xf] %vm488_vm1, %v600_v20  ;;  %513 = vst.msk [vmem:[%s958_s3 + $0x60] sm:$0xf] %vm488_vm1, %v616_v21  ;;  %v601_v26 = vpack.c.bf16 %v269_v22, %v269_v22  ;;  %v617_v27 = vpack.c.bf16 %v333_v23, %v333_v23 }
  0xf4   :  { %500 = vst.msk [vmem:[%s958_s3 + $0x2c] sm:$0xf] %vm488_vm1, %v603_v24  ;;  %516 = vst.msk [vmem:[%s958_s3 + $0x6c] sm:$0xf] %vm488_vm1, %v619_v25 }
  0xf5   :  { %498 = vst.msk [vmem:[%s958_s3 + $0x24] sm:$0xf] %vm488_vm1, %v601_v26  ;;  %514 = vst.msk [vmem:[%s958_s3 + $0x64] sm:$0xf] %vm488_vm1, %v617_v27  ;;  %v660_v28 = vpop.f32.mrb[12].mxu0  ;;  %v676_v29 = vpop.f32.mrb[12].mxu1 }
  0xf6   :  { %v290_v30 = vadd.f32 %v660_v28, %v793_v18  ;;  %v354_v31 = vadd.f32 %v676_v29, %v793_v18  ;;  %v281_v32 = vpop.f32.mrb[13].mxu0  ;;  %v345_v33 = vpop.f32.mrb[13].mxu1 }
  0xf7   :  { %v282_v34 = vadd.f32 %v793_v18, %v281_v32  ;;  %v346_v35 = vadd.f32 %v793_v18, %v345_v33  ;;  %v661_v36 = vpop.f32.mrb[14].mxu0  ;;  %v677_v37 = vpop.f32.mrb[14].mxu1 }
  0xf8   :  { %v606_v38 = vpack.c.bf16 %v290_v30, %v290_v30  ;;  %v622_v39 = vpack.c.bf16 %v354_v31, %v354_v31  ;;  %v293_v40 = vadd.f32 %v661_v36, %v793_v18  ;;  %v357_v41 = vadd.f32 %v677_v37, %v793_v18  ;;  %v284_v42 = vpop.f32.mrb[15].mxu0  ;;  %v348_v43 = vpop.f32.mrb[15].mxu1 }
  0xf9   :  { %v604_v44 = vpack.c.bf16 %v282_v34, %v282_v34  ;;  %v620_v45 = vpack.c.bf16 %v346_v35, %v346_v35  ;;  %v285_v46 = vadd.f32 %v793_v18, %v284_v42  ;;  %v349_v47 = vadd.f32 %v793_v18, %v348_v43 }
  0xfa   :  { %503 = vst.msk [vmem:[%s958_s3 + $0x38] sm:$0xf] %vm488_vm1, %v606_v38  ;;  %519 = vst.msk [vmem:[%s958_s3 + $0x78] sm:$0xf] %vm488_vm1, %v622_v39  ;;  %v607_v48 = vpack.c.bf16 %v293_v40, %v293_v40  ;;  %v623_v49 = vpack.c.bf16 %v357_v41, %v357_v41 }
  0xfb   :  { %501 = vst.msk [vmem:[%s958_s3 + $0x30] sm:$0xf] %vm488_vm1, %v604_v44  ;;  %517 = vst.msk [vmem:[%s958_s3 + $0x70] sm:$0xf] %vm488_vm1, %v620_v45  ;;  %v605_v18 = vpack.c.bf16 %v285_v46, %v285_v46  ;;  %v621_v50 = vpack.c.bf16 %v349_v47, %v349_v47 }
  0xfc   :  { %504 = vst.msk [vmem:[%s958_s3 + $0x3c] sm:$0xf] %vm488_vm1, %v607_v48  ;;  %520 = vst.msk [vmem:[%s958_s3 + $0x7c] sm:$0xf] %vm488_vm1, %v623_v49 }
  0xfd   :  { %502 = vst.msk [vmem:[%s958_s3 + $0x34] sm:$0xf] %vm488_vm1, %v605_v18  ;;  %518 = vst.msk [vmem:[%s958_s3 + $0x74] sm:$0xf] %vm488_vm1, %v621_v50 }

// kernel: abstract_gru_forward.3
= control target key start
LH: loop header
LB: loop body
LE: loop exit
PB: predicated region body
PF: predicated region fallthrough
CT: control target
= control target key end

     0   :  { %10 = vsyncpa [#allocation4], 0  ;;  %s2295_s15 = smov 0   ;;  %s2297_s16 = smov 0   ;;  %s2686_s0 = inlined_call_operand.vmem [shape: bf16[32,8,96], index: 0, kind: input, shape index: {}]   ;;  %s2687_s1 = inlined_call_operand.vmem [shape: f32[8,32], index: 1, kind: input, shape index: {}]   ;;  %s2688_s2 = inlined_call_operand.vmem [shape: bf16[32,96], index: 2, kind: input, shape index: {}]   ;;  %s2689_s3 = inlined_call_operand.vmem [shape: bf16[32,8,32], index: 3, kind: output, shape index: {0}]   ;;  %s2690_s4 = inlined_call_operand.hbm [shape: f32[8,32], index: 4, kind: output, shape index: {1}]  }
   0x1   :  { %s2299_s17 = smov 0  }
   0x2 LB: > { %s1788_s18 = sadd.s32 4294967295, %s2262_s17   ;;  %s25_s19 = sadd.s32 1, %s2258_s16  ;;  %s2262_s17 = sphi %s2299_s17, %s16_s17   ;;  %s2258_s16 = sphi %s2297_s16, %s2693_s16   ;;  %s2254_s15 = sphi %s2295_s15, %s2692_s15  }
   0x3   : > { %p26_p0 = scmp.ge.s32.totalorder %s25_s19, 2  ;;  %p1793_p1 = scmp.ge.s32.totalorder %s2262_s17, 1 }
   0x4   : > { %p195_p2 = scmp.lt.s32.totalorder %s2262_s17, 3 }
   0x5   : > { %s2695_s19 = smov (%p26_p0, %s25_s19), 0 }
   0x6   : > { %p196_p3 = pnand %p1793_p1, %p195_p2 }
   0x7   : > { %s1794_s20 = sshll.u32 (!%p196_p3), %s2254_s15, 4  ;;  %p1798_p5 = scmp.ne.s32.totalorder (!%p196_p3), %s2254_s15, 0 }
   0x8   : > { %199 = sbr.rel (%p196_p3) target bundleno = 13132 (0x334c), region = 32  ;;  %p232_p4 = scmp.lt.s32.totalorder (!%p196_p3), %s1794_s20, 31 }
   0xf   : > { %s2697_s20 = smov (!%p232_p4, %s1794_s20), 31  ;;  %257 = sbr.rel (%p1798_p5) target bundleno = 22 (0x16), region = 36 }
  0x10   : > { %s1795_s21 = sshll.u32 %s2697_s20, 2  ;;  %v258_v0 = vld [vmem:[%s2687_s1] sm:$0xff] (!%p1798_p5)  ;;  %vm259_vm0 = vcmask (!%p1798_p5), 261120  }
  0x11   : > { %s2320_s24 = scalar_lea.vmem %s2686_s0, %s1795_s21  ;;  %s2325_s27 = scalar_lea.vmem %s2689_s3, %s1795_s21  ;;  %260 = vst.msk [vmem:[#allocation2] sm:$0xff] (!%p1798_p5), %vm259_vm0, %v258_v0 }
  0x16 PF: > { %v2334_v1 = vld [vmem:[%s2688_s2] sm:$0xff]   ;;  %v2264_v2 = vmov 0.0   ;;  %v2342_v3 = vld [vmem:[%s2688_s2 + $0x8] sm:$0xff]   ;;  %vm2265_vm1 = vmmov 0   ;;  %vm281_vm2 = vcmask 261120   ;;  %s2266_s8 = smov 64  }
  0x17   : > { %1948 = vmatprep.subr.bf16.mxu0 %v2264_v2  ;;  %1956 = vmatprep.subr.bf16.mxu1 %v2264_v2  ;;  %v266_v10 = vld [vmem:[%s2320_s24] sm:$0xff]   ;;  %s2267_s9 = smov 32   ;;  %s2268_s10 = smov 96   ;;  %v1809_v56 = vld [vmem:[%s2320_s24 + $0x8] sm:$0xff]   ;;  %vm365_vm3 = vcmask 257024  }
  0x18   : > { %1949 = vmatpush3.bf16.msra.mxu0 %v2334_v1  ;;  %1952 = vmatprep.mubr.msk.bf16.mxu0 %vm2265_vm1, %v2264_v2  ;;  %v265_v4 = vld [vmem:[#allocation2] sm:$0xff]  ;;  %v267_v11 = vunpack.c.l.bf16 %v266_v10  ;;  %v369_v34 = vunpack.c.h.bf16 %v266_v10  ;;  %v455_v57 = vunpack.c.l.bf16 %v1809_v56  ;;  %p1879_p6 = scmp.ne.s32.totalorder %s2254_s15, 1 }
  0x19   : > { %1950 = vmatprep.subr.bf16.mxu0 %v2264_v2  ;;  %1957 = vmatpush3.bf16.msra.mxu1 %v2334_v1  ;;  %v268_v5 = vpack.c.bf16 %v265_v4, %v265_v4 }
  0x1a   : > { %1958 = vmatprep.subr.bf16.mxu1 %v2264_v2  ;;  %1960 = vmatprep.mubr.msk.bf16.mxu1 %vm2265_vm1, %v2264_v2 }
  0x1c   : > { %1951 = vmatpush3.bf16.msra.mxu0 %v2342_v3 }
  0x1d   : > { %1959 = vmatpush3.bf16.msra.mxu1 %v2342_v3  ;;  %1964 = vmatprep.subr.bf16.mxu0 %v2264_v2 }
  0x1e   : > { %1972 = vmatprep.subr.bf16.mxu1 %v2264_v2 }
  0x1f   : > { %1953 = vmatmul.mubr.msk.bf16.vlgmr.msra.gmra.mrb[0].mxu0 %vm281_vm2, %v268_v5 }
  0x20   : > { %1965 = vmatpush3.bf16.msra.mxu0 %v2334_v1  ;;  %1968 = vmatprep.mubr.msk.bf16.mxu0 %vm2265_vm1, %v2264_v2 }
  0x21   : > { %1966 = vmatprep.subr.bf16.mxu0 %v2264_v2 }
  0x24   : > { %1967 = vmatpush3.bf16.msra.mxu0 %v2342_v3 }
  0x25   : > { %1980 = vmatprep.subr.bf16.mxu0 %v2264_v2 }
  0xf2   : > { %v319_v6 = vpop.f32.mrb[0].mxu0 }
  0xf3   : > { %333 = vrot.lane.b32.xlu0 %v319_v6, %s2266_s8  ;;  %v1954_v7 = vpop.f32.mrb[1].mxu0  ;;  %v325_v12 = vadd.f32 %v319_v6, %v267_v11 }
  0xf4   : > { %v322_v8 = vpop.f32.mrb[2].mxu0 }
  0xf5   : > { %v1955_v9 = vpop.f32.mrb[3].mxu0  ;;  %v1802_v13 = vmul.f32 -1.442695, %v325_v12 }
  0xf7   : > { %2114 = vpow2.f32 %v1802_v13 }
 0x101   : > { %v2115_v14 = vpop.eup %2114 }
 0x102   : > { %v329_v15 = vadd.f32 1.0, %v2115_v14 }
 0x104   : > { %2116 = vrcp.f32 %v329_v15 }
 0x10e   : > { %v2117_v16 = vpop.eup %2116 }
 0x165   : > { %v334_v17 = vpop.permute.xlu0 %333 }
 0x166   : > { %v336_v18 = vmul.f32 %v2117_v16, %v334_v17 }
 0x168   : > { %338 = vrot.lane.b32.xlu0 %v336_v18, %s2266_s8  ;;  %v541_v18 = vunpack.c.h.bf16 %v1809_v56 }
 0x1da   : > { %v339_v19 = vpop.permute.xlu0 %338 }
 0x1db   : > { %v341_v20 = vadd.f32 %v339_v19, %v267_v11 }
 0x1dd   : > { %2118 = vtanh.f32 %v341_v20 }
 0x1e7   : > { %v2119_v21 = vpop.eup %2118 }
 0x1e8   : > { %344 = vrot.lane.b32.xlu1 %v2119_v21, %s2266_s8 }
 0x25a   : > { %v345_v22 = vpop.permute.xlu1 %344 }
 0x25b   : > { %v347_v23 = vsub.f32 %v265_v4, %v345_v22 }
 0x25d   : > { %349 = vrot.lane.b32.xlu1 %v347_v23, %s2267_s9 }
 0x2cf   : > { %v350_v24 = vpop.permute.xlu1 %349 }
 0x2d0   : > { %v352_v25 = vmul.f32 %v2117_v16, %v350_v24 }
 0x2d2   : > { %354 = vrot.lane.b32.xlu0 %v352_v25, %s2267_s9 }
 0x344   : > { %v355_v26 = vpop.permute.xlu0 %354 }
 0x345   : > { %v357_v27 = vadd.f32 %v2119_v21, %v355_v26 }
 0x347   : > { %v2368_v28 = vpack.c.bf16 %v357_v27, %v357_v27 }
 0x349   : > { %370 = vrot.lane.b32.xlu1 %v2368_v28, %s2266_s8 }
 0x3bb   : > { %v371_v29 = vpop.permute.xlu1 %370 }
 0x3bc   : > { %1961 = vmatmul.mubr.msk.bf16.vlgmr.msra.gmra.mrb[0].mxu1 %vm281_vm2, %v371_v29 }
 0x3bd   : > { %1973 = vmatpush3.bf16.msra.mxu1 %v2334_v1  ;;  %1976 = vmatprep.mubr.msk.bf16.mxu1 %vm2265_vm1, %v2264_v2 }
 0x3be   : > { %1974 = vmatprep.subr.bf16.mxu1 %v2264_v2 }
 0x3c1   : > { %1975 = vmatpush3.bf16.msra.mxu1 %v2342_v3 }
 0x3c2   : > { %1988 = vmatprep.subr.bf16.mxu1 %v2264_v2 }
 0x48f   : > { %v409_v30 = vpop.f32.mrb[0].mxu1 }
 0x490   : > { %423 = vrot.lane.b32.xlu0 %v409_v30, %s2266_s8  ;;  %v1962_v31 = vpop.f32.mrb[1].mxu1  ;;  %v415_v35 = vadd.f32 %v409_v30, %v369_v34 }
 0x491   : > { %v412_v32 = vpop.f32.mrb[2].mxu1 }
 0x492   : > { %v1963_v33 = vpop.f32.mrb[3].mxu1  ;;  %v1806_v36 = vmul.f32 -1.442695, %v415_v35 }
 0x494   : > { %2120 = vpow2.f32 %v1806_v36 }
 0x49e   : > { %v2121_v37 = vpop.eup %2120 }
 0x49f   : > { %v419_v38 = vadd.f32 1.0, %v2121_v37 }
 0x4a1   : > { %2122 = vrcp.f32 %v419_v38 }
 0x4ab   : > { %v2123_v39 = vpop.eup %2122 }
 0x502   : > { %v424_v40 = vpop.permute.xlu0 %423 }
 0x503   : > { %v426_v41 = vmul.f32 %v2123_v39, %v424_v40 }
 0x505   : > { %428 = vrot.lane.b32.xlu1 %v426_v41, %s2266_s8  ;;  %v1819_v41 = vld [vmem:[%s2320_s24 + $0x10] sm:$0xff]  }
 0x577   : > { %v429_v42 = vpop.permute.xlu1 %428 }
 0x578   : > { %v431_v43 = vadd.f32 %v429_v42, %v369_v34  ;;  %v627_v42 = vunpack.c.l.bf16 %v1819_v41 }
 0x57a   : > { %2124 = vtanh.f32 %v431_v43 }
 0x584   : > { %v2125_v44 = vpop.eup %2124 }
 0x585   : > { %v433_v45 = vsub.f32 %v357_v27, %v2125_v44 }
 0x587   : > { %435 = vrot.lane.b32.xlu0 %v433_v45, %s2268_s10 }
 0x5f9   : > { %v436_v46 = vpop.permute.xlu0 %435 }
 0x5fa   : > { %v438_v47 = vmul.f32 %v2123_v39, %v436_v46 }
 0x5fc   : > { %440 = vrot.lane.b32.xlu1 %v438_v47, %s2267_s9 }
 0x66e   : > { %v441_v48 = vpop.permute.xlu1 %440 }
 0x66f   : > { %v443_v49 = vadd.f32 %v2125_v44, %v441_v48 }
 0x671   : > { %v2383_v50 = vpack.c.bf16 %v443_v49, %v443_v49 }
 0x673   : > { %456 = vrot.lane.b32.xlu0 %v2383_v50, %s2266_s8 }
 0x6e5   : > { %v457_v51 = vpop.permute.xlu0 %456 }
 0x6e6   : > { %1969 = vmatmul.mubr.msk.bf16.vlgmr.msra.gmra.mrb[4].mxu0 %vm281_vm2, %v457_v51 }
 0x6e7   : > { %1981 = vmatpush3.bf16.msra.mxu0 %v2334_v1  ;;  %1984 = vmatprep.mubr.msk.bf16.mxu0 %vm2265_vm1, %v2264_v2 }
 0x6e8   : > { %1982 = vmatprep.subr.bf16.mxu0 %v2264_v2 }
 0x6eb   : > { %1983 = vmatpush3.bf16.msra.mxu0 %v2342_v3 }
 0x6ec   : > { %1996 = vmatprep.subr.bf16.mxu0 %v2264_v2 }
 0x7b9   : > { %v495_v52 = vpop.f32.mrb[4].mxu0 }
 0x7ba   : > { %509 = vrot.lane.b32.xlu1 %v495_v52, %s2266_s8  ;;  %v1970_v53 = vpop.f32.mrb[5].mxu0  ;;  %v501_v58 = vadd.f32 %v495_v52, %v455_v57 }
 0x7bb   : > { %v498_v54 = vpop.f32.mrb[6].mxu0 }
 0x7bc   : > { %v1971_v55 = vpop.f32.mrb[7].mxu0  ;;  %v1811_v59 = vmul.f32 -1.442695, %v501_v58 }
 0x7be   : > { %2126 = vpow2.f32 %v1811_v59 }
 0x7c8   : > { %v2127_v60 = vpop.eup %2126 }
 0x7c9   : > { %v505_v61 = vadd.f32 1.0, %v2127_v60 }
 0x7cb   : > { %2128 = vrcp.f32 %v505_v61 }
 0x7d5   : > { %v2129_v62 = vpop.eup %2128 }
 0x82c   : > { %v510_v63 = vpop.permute.xlu1 %509 }
 0x82d   : > { %v512_v0 = vmul.f32 %v2129_v62, %v510_v63 }
 0x82f   : > { %514 = vrot.lane.b32.xlu0 %v512_v0, %s2266_s8 }
 0x8a1   : > { %v515_v4 = vpop.permute.xlu0 %514 }
 0x8a2   : > { %v517_v5 = vadd.f32 %v515_v4, %v455_v57  ;;  %v713_v4 = vunpack.c.h.bf16 %v1819_v41 }
 0x8a4   : > { %2130 = vtanh.f32 %v517_v5 }
 0x8ae   : > { %v2131_v6 = vpop.eup %2130 }
 0x8af   : > { %v519_v7 = vsub.f32 %v443_v49, %v2131_v6 }
 0x8b1   : > { %521 = vrot.lane.b32.xlu1 %v519_v7, %s2268_s10 }
 0x923   : > { %v522_v8 = vpop.permute.xlu1 %521 }
 0x924   : > { %v524_v9 = vmul.f32 %v2129_v62, %v522_v8 }
 0x926   : > { %526 = vrot.lane.b32.xlu0 %v524_v9, %s2267_s9 }
 0x998   : > { %v527_v10 = vpop.permute.xlu0 %526 }
 0x999   : > { %v529_v11 = vadd.f32 %v2131_v6, %v527_v10 }
 0x99b   : > { %v2399_v12 = vpack.c.bf16 %v529_v11, %v529_v11 }
 0x99d   : > { %542 = vrot.lane.b32.xlu1 %v2399_v12, %s2266_s8 }
 0xa0f   : > { %v543_v13 = vpop.permute.xlu1 %542 }
 0xa10   : > { %1977 = vmatmul.mubr.msk.bf16.vlgmr.msra.gmra.mrb[4].mxu1 %vm281_vm2, %v543_v13 }
 0xa11   : > { %1989 = vmatpush3.bf16.msra.mxu1 %v2334_v1  ;;  %1992 = vmatprep.mubr.msk.bf16.mxu1 %vm2265_vm1, %v2264_v2 }
 0xa12   : > { %1990 = vmatprep.subr.bf16.mxu1 %v2264_v2 }
 0xa15   : > { %1991 = vmatpush3.bf16.msra.mxu1 %v2342_v3 }
 0xa16   : > { %2004 = vmatprep.subr.bf16.mxu1 %v2264_v2 }
 0xae3   : > { %v581_v14 = vpop.f32.mrb[4].mxu1 }
 0xae4   : > { %595 = vrot.lane.b32.xlu0 %v581_v14, %s2266_s8  ;;  %v1978_v15 = vpop.f32.mrb[5].mxu1  ;;  %v587_v19 = vadd.f32 %v581_v14, %v541_v18 }
 0xae5   : > { %v584_v16 = vpop.f32.mrb[6].mxu1 }
 0xae6   : > { %v1979_v17 = vpop.f32.mrb[7].mxu1  ;;  %v1816_v20 = vmul.f32 -1.442695, %v587_v19 }
 0xae8   : > { %2132 = vpow2.f32 %v1816_v20 }
 0xaf2   : > { %v2133_v21 = vpop.eup %2132 }
 0xaf3   : > { %v591_v22 = vadd.f32 1.0, %v2133_v21 }
 0xaf5   : > { %2134 = vrcp.f32 %v591_v22 }
 0xaff   : > { %v2135_v23 = vpop.eup %2134 }
 0xb56   : > { %v596_v24 = vpop.permute.xlu0 %595 }
 0xb57   : > { %v598_v25 = vmul.f32 %v2135_v23, %v596_v24 }
 0xb59   : > { %600 = vrot.lane.b32.xlu1 %v598_v25, %s2266_s8 }
 0xbcb   : > { %v601_v26 = vpop.permute.xlu1 %600 }
 0xbcc   : > { %v603_v27 = vadd.f32 %v601_v26, %v541_v18 }
 0xbce   : > { %2136 = vtanh.f32 %v603_v27  ;;  %v1829_v27 = vld [vmem:[%s2320_s24 + $0x18] sm:$0xff]  }
 0xbd8   : > { %v2137_v29 = vpop.eup %2136 }
 0xbd9   : > { %v605_v30 = vsub.f32 %v529_v11, %v2137_v29 }
 0xbdb   : > { %607 = vrot.lane.b32.xlu0 %v605_v30, %s2268_s10 }
 0xc4d   : > { %v608_v31 = vpop.permute.xlu0 %607 }
 0xc4e   : > { %v610_v32 = vmul.f32 %v2135_v23, %v608_v31 }
 0xc50   : > { %612 = vrot.lane.b32.xlu1 %v610_v32, %s2267_s9 }
 0xcc2   : > { %v613_v33 = vpop.permute.xlu1 %612 }
 0xcc3   : > { %v615_v34 = vadd.f32 %v2137_v29, %v613_v33  ;;  %v799_v29 = vunpack.c.l.bf16 %v1829_v27 }
 0xcc5   : > { %v2414_v35 = vpack.c.bf16 %v615_v34, %v615_v34 }
 0xcc7   : > { %628 = vrot.lane.b32.xlu0 %v2414_v35, %s2266_s8 }
 0xd39   : > { %v629_v36 = vpop.permute.xlu0 %628 }
 0xd3a   : > { %1985 = vmatmul.mubr.msk.bf16.vlgmr.msra.gmra.mrb[8].mxu0 %vm281_vm2, %v629_v36 }
 0xd3b   : > { %1997 = vmatpush3.bf16.msra.mxu0 %v2334_v1  ;;  %2000 = vmatprep.mubr.msk.bf16.mxu0 %vm2265_vm1, %v2264_v2 }
 0xd3c   : > { %1998 = vmatprep.subr.bf16.mxu0 %v2264_v2 }
 0xd3f   : > { %1999 = vmatpush3.bf16.msra.mxu0 %v2342_v3 }
 0xd40   : > { %2012 = vmatprep.subr.bf16.mxu0 %v2264_v2 }
 0xe0d   : > { %v667_v37 = vpop.f32.mrb[8].mxu0 }
 0xe0e   : > { %681 = vrot.lane.b32.xlu1 %v667_v37, %s2266_s8  ;;  %v1986_v38 = vpop.f32.mrb[9].mxu0  ;;  %v673_v43 = vadd.f32 %v667_v37, %v627_v42 }
 0xe0f   : > { %v670_v39 = vpop.f32.mrb[10].mxu0 }
 0xe10   : > { %v1987_v40 = vpop.f32.mrb[11].mxu0  ;;  %v1821_v44 = vmul.f32 -1.442695, %v673_v43 }
 0xe12   : > { %2138 = vpow2.f32 %v1821_v44 }
 0xe1c   : > { %v2139_v45 = vpop.eup %2138 }
 0xe1d   : > { %v677_v46 = vadd.f32 1.0, %v2139_v45 }
 0xe1f   : > { %2140 = vrcp.f32 %v677_v46 }
 0xe29   : > { %v2141_v47 = vpop.eup %2140 }
 0xe80   : > { %v682_v48 = vpop.permute.xlu1 %681 }
 0xe81   : > { %v684_v49 = vmul.f32 %v2141_v47, %v682_v48 }
 0xe83   : > { %686 = vrot.lane.b32.xlu0 %v684_v49, %s2266_s8 }
 0xef5   : > { %v687_v51 = vpop.permute.xlu0 %686 }
 0xef6   : > { %v689_v52 = vadd.f32 %v687_v51, %v627_v42 }
 0xef8   : > { %2142 = vtanh.f32 %v689_v52 }
 0xf02   : > { %v2143_v53 = vpop.eup %2142 }
 0xf03   : > { %v691_v54 = vsub.f32 %v615_v34, %v2143_v53 }
 0xf05   : > { %693 = vrot.lane.b32.xlu1 %v691_v54, %s2268_s10 }
 0xf77   : > { %v694_v55 = vpop.permute.xlu1 %693 }
 0xf78   : > { %v696_v56 = vmul.f32 %v2141_v47, %v694_v55 }
 0xf7a   : > { %698 = vrot.lane.b32.xlu0 %v696_v56, %s2267_s9 }
 0xfec   : > { %v699_v57 = vpop.permute.xlu0 %698 }
 0xfed   : > { %v701_v58 = vadd.f32 %v2143_v53, %v699_v57  ;;  %v885_v53 = vunpack.c.h.bf16 %v1829_v27 }
 0xfef   : > { %v2430_v59 = vpack.c.bf16 %v701_v58, %v701_v58 }
 0xff1   : > { %714 = vrot.lane.b32.xlu1 %v2430_v59, %s2266_s8 }
0x1063   : > { %v715_v60 = vpop.permute.xlu1 %714 }
0x1064   : > { %1993 = vmatmul.mubr.msk.bf16.vlgmr.msra.gmra.mrb[8].mxu1 %vm281_vm2, %v715_v60 }
0x1065   : > { %2005 = vmatpush3.bf16.msra.mxu1 %v2334_v1  ;;  %2008 = vmatprep.mubr.msk.bf16.mxu1 %vm2265_vm1, %v2264_v2 }
0x1066   : > { %2006 = vmatprep.subr.bf16.mxu1 %v2264_v2 }
0x1069   : > { %2007 = vmatpush3.bf16.msra.mxu1 %v2342_v3 }
0x106a   : > { %2020 = vmatprep.subr.bf16.mxu1 %v2264_v2 }
0x1137   : > { %v753_v61 = vpop.f32.mrb[8].mxu1 }
0x1138   : > { %767 = vrot.lane.b32.xlu0 %v753_v61, %s2266_s8  ;;  %v1994_v62 = vpop.f32.mrb[9].mxu1  ;;  %v759_v5 = vadd.f32 %v753_v61, %v713_v4 }
0x1139   : > { %v756_v63 = vpop.f32.mrb[10].mxu1 }
0x113a   : > { %v1995_v0 = vpop.f32.mrb[11].mxu1  ;;  %v1826_v6 = vmul.f32 -1.442695, %v759_v5 }
0x113c   : > { %2144 = vpow2.f32 %v1826_v6 }
0x1146   : > { %v2145_v7 = vpop.eup %2144 }
0x1147   : > { %v763_v8 = vadd.f32 1.0, %v2145_v7 }
0x1149   : > { %2146 = vrcp.f32 %v763_v8 }
0x1153   : > { %v2147_v9 = vpop.eup %2146 }
0x11aa   : > { %v768_v10 = vpop.permute.xlu0 %767 }
0x11ab   : > { %v770_v11 = vmul.f32 %v2147_v9, %v768_v10 }
0x11ad   : > { %772 = vrot.lane.b32.xlu1 %v770_v11, %s2266_s8 }
0x121f   : > { %v773_v13 = vpop.permute.xlu1 %772 }
0x1220   : > { %v775_v14 = vadd.f32 %v773_v13, %v713_v4 }
0x1222   : > { %2148 = vtanh.f32 %v775_v14 }
0x122c   : > { %v2149_v15 = vpop.eup %2148 }
0x122d   : > { %v777_v16 = vsub.f32 %v701_v58, %v2149_v15 }
0x122f   : > { %779 = vrot.lane.b32.xlu0 %v777_v16, %s2268_s10  ;;  %v1839_v16 = vld [vmem:[%s2320_s24 + $0x20] sm:$0xff]  }
0x12a1   : > { %v780_v17 = vpop.permute.xlu0 %779 }
0x12a2   : > { %v782_v18 = vmul.f32 %v2147_v9, %v780_v17  ;;  %v971_v17 = vunpack.c.l.bf16 %v1839_v16 }
0x12a4   : > { %784 = vrot.lane.b32.xlu1 %v782_v18, %s2267_s9 }
0x1316   : > { %v785_v19 = vpop.permute.xlu1 %784 }
0x1317   : > { %v787_v20 = vadd.f32 %v2149_v15, %v785_v19 }
0x1319   : > { %v2445_v21 = vpack.c.bf16 %v787_v20, %v787_v20 }
0x131b   : > { %800 = vrot.lane.b32.xlu0 %v2445_v21, %s2266_s8 }
0x138d   : > { %v801_v22 = vpop.permute.xlu0 %800 }
0x138e   : > { %2001 = vmatmul.mubr.msk.bf16.vlgmr.msra.gmra.mrb[12].mxu0 %vm281_vm2, %v801_v22 }
0x138f   : > { %2013 = vmatpush3.bf16.msra.mxu0 %v2334_v1  ;;  %2016 = vmatprep.mubr.msk.bf16.mxu0 %vm2265_vm1, %v2264_v2 }
0x1390   : > { %2014 = vmatprep.subr.bf16.mxu0 %v2264_v2 }
0x1393   : > { %2015 = vmatpush3.bf16.msra.mxu0 %v2342_v3 }
0x1394   : > { %2028 = vmatprep.subr.bf16.mxu0 %v2264_v2 }
0x1461   : > { %v839_v23 = vpop.f32.mrb[12].mxu0 }
0x1462   : > { %853 = vrot.lane.b32.xlu1 %v839_v23, %s2266_s8  ;;  %v2002_v24 = vpop.f32.mrb[13].mxu0  ;;  %v845_v30 = vadd.f32 %v839_v23, %v799_v29 }
0x1463   : > { %v842_v25 = vpop.f32.mrb[14].mxu0 }
0x1464   : > { %v2003_v26 = vpop.f32.mrb[15].mxu0  ;;  %v1831_v31 = vmul.f32 -1.442695, %v845_v30 }
0x1466   : > { %2150 = vpow2.f32 %v1831_v31 }
0x1470   : > { %v2151_v32 = vpop.eup %2150 }
0x1471   : > { %v849_v33 = vadd.f32 1.0, %v2151_v32 }
0x1473   : > { %2152 = vrcp.f32 %v849_v33 }
0x147d   : > { %v2153_v34 = vpop.eup %2152 }
0x14d4   : > { %v854_v36 = vpop.permute.xlu1 %853 }
0x14d5   : > { %v856_v37 = vmul.f32 %v2153_v34, %v854_v36 }
0x14d7   : > { %858 = vrot.lane.b32.xlu0 %v856_v37, %s2266_s8 }
0x1549   : > { %v859_v38 = vpop.permute.xlu0 %858 }
0x154a   : > { %v861_v39 = vadd.f32 %v859_v38, %v799_v29 }
0x154c   : > { %2154 = vtanh.f32 %v861_v39 }
0x1556   : > { %v2155_v40 = vpop.eup %2154 }
0x1557   : > { %v863_v41 = vsub.f32 %v787_v20, %v2155_v40 }
0x1559   : > { %865 = vrot.lane.b32.xlu1 %v863_v41, %s2268_s10 }
0x15cb   : > { %v866_v42 = vpop.permute.xlu1 %865 }
0x15cc   : > { %v868_v43 = vmul.f32 %v2153_v34, %v866_v42  ;;  %v1057_v42 = vunpack.c.h.bf16 %v1839_v16 }
0x15ce   : > { %870 = vrot.lane.b32.xlu0 %v868_v43, %s2267_s9 }
0x1640   : > { %v871_v44 = vpop.permute.xlu0 %870 }
0x1641   : > { %v873_v45 = vadd.f32 %v2155_v40, %v871_v44 }
0x1643   : > { %v2461_v46 = vpack.c.bf16 %v873_v45, %v873_v45 }
0x1645   : > { %886 = vrot.lane.b32.xlu1 %v2461_v46, %s2266_s8 }
0x16b7   : > { %v887_v47 = vpop.permute.xlu1 %886 }
0x16b8   : > { %2009 = vmatmul.mubr.msk.bf16.vlgmr.msra.gmra.mrb[12].mxu1 %vm281_vm2, %v887_v47 }
0x16b9   : > { %2021 = vmatpush3.bf16.msra.mxu1 %v2334_v1  ;;  %2024 = vmatprep.mubr.msk.bf16.mxu1 %vm2265_vm1, %v2264_v2 }
0x16ba   : > { %2022 = vmatprep.subr.bf16.mxu1 %v2264_v2 }
0x16bd   : > { %2023 = vmatpush3.bf16.msra.mxu1 %v2342_v3 }
0x16be   : > { %2036 = vmatprep.subr.bf16.mxu1 %v2264_v2 }
0x178b   : > { %v925_v48 = vpop.f32.mrb[12].mxu1 }
0x178c   : > { %939 = vrot.lane.b32.xlu0 %v925_v48, %s2266_s8  ;;  %v2010_v49 = vpop.f32.mrb[13].mxu1  ;;  %v931_v54 = vadd.f32 %v925_v48, %v885_v53 }
0x178d   : > { %v928_v51 = vpop.f32.mrb[14].mxu1 }
0x178e   : > { %v2011_v52 = vpop.f32.mrb[15].mxu1  ;;  %v1836_v55 = vmul.f32 -1.442695, %v931_v54 }
0x1790   : > { %2156 = vpow2.f32 %v1836_v55 }
0x179a   : > { %v2157_v56 = vpop.eup %2156 }
0x179b   : > { %v935_v57 = vadd.f32 1.0, %v2157_v56 }
0x179d   : > { %2158 = vrcp.f32 %v935_v57 }
0x17a7   : > { %v2159_v58 = vpop.eup %2158 }
0x17fe   : > { %v940_v60 = vpop.permute.xlu0 %939 }
0x17ff   : > { %v942_v61 = vmul.f32 %v2159_v58, %v940_v60 }
0x1801   : > { %944 = vrot.lane.b32.xlu1 %v942_v61, %s2266_s8 }
0x1873   : > { %v945_v62 = vpop.permute.xlu1 %944 }
0x1874   : > { %v947_v63 = vadd.f32 %v945_v62, %v885_v53 }
0x1876   : > { %2160 = vtanh.f32 %v947_v63 }
0x1880   : > { %v2161_v0 = vpop.eup %2160 }
0x1881   : > { %v949_v4 = vsub.f32 %v873_v45, %v2161_v0 }
0x1883   : > { %951 = vrot.lane.b32.xlu0 %v949_v4, %s2268_s10 }
0x18f5   : > { %v952_v5 = vpop.permute.xlu0 %951 }
0x18f6   : > { %v954_v6 = vmul.f32 %v2159_v58, %v952_v5 }
0x18f8   : > { %956 = vrot.lane.b32.xlu1 %v954_v6, %s2267_s9  ;;  %v1849_v6 = vld [vmem:[%s2320_s24 + $0x28] sm:$0xff]  }
0x196a   : > { %v957_v7 = vpop.permute.xlu1 %956 }
0x196b   : > { %v959_v8 = vadd.f32 %v2161_v0, %v957_v7  ;;  %v1143_v7 = vunpack.c.l.bf16 %v1849_v6 }
0x196d   : > { %v2476_v9 = vpack.c.bf16 %v959_v8, %v959_v8 }
0x196f   : > { %972 = vrot.lane.b32.xlu0 %v2476_v9, %s2266_s8 }
0x19e1   : > { %v973_v10 = vpop.permute.xlu0 %972 }
0x19e2   : > { %2017 = vmatmul.mubr.msk.bf16.vlgmr.msra.gmra.mrb[16].mxu0 %vm281_vm2, %v973_v10 }
0x19e3   : > { %2029 = vmatpush3.bf16.msra.mxu0 %v2334_v1  ;;  %2032 = vmatprep.mubr.msk.bf16.mxu0 %vm2265_vm1, %v2264_v2 }
0x19e4   : > { %2030 = vmatprep.subr.bf16.mxu0 %v2264_v2 }
0x19e7   : > { %2031 = vmatpush3.bf16.msra.mxu0 %v2342_v3 }
0x19e8   : > { %2044 = vmatprep.subr.bf16.mxu0 %v2264_v2 }
0x1ab5   : > { %v1011_v11 = vpop.f32.mrb[16].mxu0 }
0x1ab6   : > { %1025 = vrot.lane.b32.xlu1 %v1011_v11, %s2266_s8  ;;  %v2018_v13 = vpop.f32.mrb[17].mxu0  ;;  %v1017_v18 = vadd.f32 %v1011_v11, %v971_v17 }
0x1ab7   : > { %v1014_v14 = vpop.f32.mrb[18].mxu0 }
0x1ab8   : > { %v2019_v15 = vpop.f32.mrb[19].mxu0  ;;  %v1841_v19 = vmul.f32 -1.442695, %v1017_v18 }
0x1aba   : > { %2162 = vpow2.f32 %v1841_v19 }
0x1ac4   : > { %v2163_v20 = vpop.eup %2162 }
0x1ac5   : > { %v1021_v22 = vadd.f32 1.0, %v2163_v20 }
0x1ac7   : > { %2164 = vrcp.f32 %v1021_v22 }
0x1ad1   : > { %v2165_v23 = vpop.eup %2164 }
0x1b28   : > { %v1026_v24 = vpop.permute.xlu1 %1025 }
0x1b29   : > { %v1028_v25 = vmul.f32 %v2165_v23, %v1026_v24 }
0x1b2b   : > { %1030 = vrot.lane.b32.xlu0 %v1028_v25, %s2266_s8 }
0x1b9d   : > { %v1031_v26 = vpop.permute.xlu0 %1030 }
0x1b9e   : > { %v1033_v27 = vadd.f32 %v1031_v26, %v971_v17 }
0x1ba0   : > { %2166 = vtanh.f32 %v1033_v27 }
0x1baa   : > { %v2167_v29 = vpop.eup %2166 }
0x1bab   : > { %v1035_v30 = vsub.f32 %v959_v8, %v2167_v29 }
0x1bad   : > { %1037 = vrot.lane.b32.xlu1 %v1035_v30, %s2268_s10 }
0x1c1f   : > { %v1038_v31 = vpop.permute.xlu1 %1037 }
0x1c20   : > { %v1040_v32 = vmul.f32 %v2165_v23, %v1038_v31 }
0x1c22   : > { %1042 = vrot.lane.b32.xlu0 %v1040_v32, %s2267_s9 }
0x1c94   : > { %v1043_v33 = vpop.permute.xlu0 %1042 }
0x1c95   : > { %v1045_v34 = vadd.f32 %v2167_v29, %v1043_v33  ;;  %v1229_v33 = vunpack.c.h.bf16 %v1849_v6 }
0x1c97   : > { %v2492_v36 = vpack.c.bf16 %v1045_v34, %v1045_v34 }
0x1c99   : > { %1058 = vrot.lane.b32.xlu1 %v2492_v36, %s2266_s8 }
0x1d0b   : > { %v1059_v37 = vpop.permute.xlu1 %1058 }
0x1d0c   : > { %2025 = vmatmul.mubr.msk.bf16.vlgmr.msra.gmra.mrb[16].mxu1 %vm281_vm2, %v1059_v37 }
0x1d0d   : > { %2037 = vmatpush3.bf16.msra.mxu1 %v2334_v1  ;;  %2040 = vmatprep.mubr.msk.bf16.mxu1 %vm2265_vm1, %v2264_v2 }
0x1d0e   : > { %2038 = vmatprep.subr.bf16.mxu1 %v2264_v2 }
0x1d11   : > { %2039 = vmatpush3.bf16.msra.mxu1 %v2342_v3 }
0x1d12   : > { %2052 = vmatprep.subr.bf16.mxu1 %v2264_v2 }
0x1ddf   : > { %v1097_v38 = vpop.f32.mrb[16].mxu1 }
0x1de0   : > { %1111 = vrot.lane.b32.xlu0 %v1097_v38, %s2266_s8  ;;  %v2026_v39 = vpop.f32.mrb[17].mxu1  ;;  %v1103_v43 = vadd.f32 %v1097_v38, %v1057_v42 }
0x1de1   : > { %v1100_v40 = vpop.f32.mrb[18].mxu1 }
0x1de2   : > { %v2027_v41 = vpop.f32.mrb[19].mxu1  ;;  %v1846_v44 = vmul.f32 -1.442695, %v1103_v43 }
0x1de4   : > { %2168 = vpow2.f32 %v1846_v44 }
0x1dee   : > { %v2169_v45 = vpop.eup %2168 }
0x1def   : > { %v1107_v47 = vadd.f32 1.0, %v2169_v45 }
0x1df1   : > { %2170 = vrcp.f32 %v1107_v47 }
0x1dfb   : > { %v2171_v48 = vpop.eup %2170 }
0x1e52   : > { %v1112_v49 = vpop.permute.xlu0 %1111 }
0x1e53   : > { %v1114_v51 = vmul.f32 %v2171_v48, %v1112_v49 }
0x1e55   : > { %1116 = vrot.lane.b32.xlu1 %v1114_v51, %s2266_s8 }
0x1ec7   : > { %v1117_v52 = vpop.permute.xlu1 %1116 }
0x1ec8   : > { %v1119_v53 = vadd.f32 %v1117_v52, %v1057_v42 }
0x1eca   : > { %2172 = vtanh.f32 %v1119_v53 }
0x1ed4   : > { %v2173_v54 = vpop.eup %2172 }
0x1ed5   : > { %v1121_v55 = vsub.f32 %v1045_v34, %v2173_v54 }
0x1ed7   : > { %1123 = vrot.lane.b32.xlu0 %v1121_v55, %s2268_s10 }
0x1f49   : > { %v1124_v56 = vpop.permute.xlu0 %1123 }
0x1f4a   : > { %v1126_v57 = vmul.f32 %v2171_v48, %v1124_v56 }
0x1f4c   : > { %1128 = vrot.lane.b32.xlu1 %v1126_v57, %s2267_s9 }
0x1fbe   : > { %v1129_v58 = vpop.permute.xlu1 %1128 }
0x1fbf   : > { %v1131_v60 = vadd.f32 %v2173_v54, %v1129_v58 }
0x1fc1   : > { %v2507_v61 = vpack.c.bf16 %v1131_v60, %v1131_v60 }
0x1fc3   : > { %1144 = vrot.lane.b32.xlu0 %v2507_v61, %s2266_s8 }
0x2035   : > { %v1145_v62 = vpop.permute.xlu0 %1144 }
0x2036   : > { %2033 = vmatmul.mubr.msk.bf16.vlgmr.msra.gmra.mrb[20].mxu0 %vm281_vm2, %v1145_v62 }
0x2037   : > { %2045 = vmatpush3.bf16.msra.mxu0 %v2334_v1  ;;  %2048 = vmatprep.mubr.msk.bf16.mxu0 %vm2265_vm1, %v2264_v2 }
0x2038   : > { %2046 = vmatprep.subr.bf16.mxu0 %v2264_v2 }
0x203b   : > { %2047 = vmatpush3.bf16.msra.mxu0 %v2342_v3 }
0x203c   : > { %2060 = vmatprep.subr.bf16.mxu0 %v2264_v2 }
0x2109   : > { %v1183_v63 = vpop.f32.mrb[20].mxu0 }
0x210a   : > { %1197 = vrot.lane.b32.xlu1 %v1183_v63, %s2266_s8  ;;  %v2034_v0 = vpop.f32.mrb[21].mxu0  ;;  %v1189_v8 = vadd.f32 %v1183_v63, %v1143_v7 }
0x210b   : > { %v1186_v4 = vpop.f32.mrb[22].mxu0 }
0x210c   : > { %v2035_v5 = vpop.f32.mrb[23].mxu0  ;;  %v1851_v10 = vmul.f32 -1.442695, %v1189_v8 }
0x210e   : > { %2174 = vpow2.f32 %v1851_v10 }
0x2118   : > { %v2175_v11 = vpop.eup %2174 }
0x2119   : > { %v1193_v13 = vadd.f32 1.0, %v2175_v11 }
0x211b   : > { %2176 = vrcp.f32 %v1193_v13 }
0x2125   : > { %v2177_v14 = vpop.eup %2176 }
0x217c   : > { %v1198_v15 = vpop.permute.xlu1 %1197 }
0x217d   : > { %v1200_v16 = vmul.f32 %v2177_v14, %v1198_v15 }
0x217f   : > { %1202 = vrot.lane.b32.xlu0 %v1200_v16, %s2266_s8 }
0x21f1   : > { %v1203_v17 = vpop.permute.xlu0 %1202 }
0x21f2   : > { %v1205_v18 = vadd.f32 %v1203_v17, %v1143_v7 }
0x21f4   : > { %2178 = vtanh.f32 %v1205_v18 }
0x21fe   : > { %v2179_v19 = vpop.eup %2178 }
0x21ff   : > { %v1207_v20 = vsub.f32 %v1131_v60, %v2179_v19  ;;  %v1859_v60 = vld [vmem:[%s2320_s24 + $0x30] sm:$0xff]  }
0x2200   : > { %v1315_v62 = vunpack.c.l.bf16 %v1859_v60 }
0x2201   : > { %1209 = vrot.lane.b32.xlu1 %v1207_v20, %s2268_s10 }
0x2273   : > { %v1210_v22 = vpop.permute.xlu1 %1209 }
0x2274   : > { %v1212_v23 = vmul.f32 %v2177_v14, %v1210_v22 }
0x2276   : > { %1214 = vrot.lane.b32.xlu0 %v1212_v23, %s2267_s9 }
0x22e8   : > { %v1215_v24 = vpop.permute.xlu0 %1214 }
0x22e9   : > { %v1217_v25 = vadd.f32 %v2179_v19, %v1215_v24 }
0x22eb   : > { %v2523_v26 = vpack.c.bf16 %v1217_v25, %v1217_v25 }
0x22ed   : > { %1230 = vrot.lane.b32.xlu1 %v2523_v26, %s2266_s8 }
0x235f   : > { %v1231_v27 = vpop.permute.xlu1 %1230 }
0x2360   : > { %2041 = vmatmul.mubr.msk.bf16.vlgmr.msra.gmra.mrb[20].mxu1 %vm281_vm2, %v1231_v27  ;;  %v1401_v27 = vunpack.c.h.bf16 %v1859_v60 }
0x2361   : > { %2053 = vmatpush3.bf16.msra.mxu1 %v2334_v1  ;;  %2056 = vmatprep.mubr.msk.bf16.mxu1 %vm2265_vm1, %v2264_v2 }
0x2362   : > { %2054 = vmatprep.subr.bf16.mxu1 %v2264_v2 }
0x2365   : > { %2055 = vmatpush3.bf16.msra.mxu1 %v2342_v3 }
0x2366   : > { %2068 = vmatprep.subr.bf16.mxu1 %v2264_v2 }
0x2433   : > { %v1269_v29 = vpop.f32.mrb[20].mxu1 }
0x2434   : > { %1283 = vrot.lane.b32.xlu0 %v1269_v29, %s2266_s8  ;;  %v2042_v30 = vpop.f32.mrb[21].mxu1  ;;  %v1275_v34 = vadd.f32 %v1269_v29, %v1229_v33 }
0x2435   : > { %v1272_v31 = vpop.f32.mrb[22].mxu1 }
0x2436   : > { %v2043_v32 = vpop.f32.mrb[23].mxu1  ;;  %v1856_v37 = vmul.f32 -1.442695, %v1275_v34 }
0x2438   : > { %2180 = vpow2.f32 %v1856_v37 }
0x2442   : > { %v2181_v38 = vpop.eup %2180 }
0x2443   : > { %v1279_v39 = vadd.f32 1.0, %v2181_v38 }
0x2445   : > { %2182 = vrcp.f32 %v1279_v39 }
0x244f   : > { %v2183_v40 = vpop.eup %2182 }
0x24a6   : > { %v1284_v41 = vpop.permute.xlu0 %1283 }
0x24a7   : > { %v1286_v42 = vmul.f32 %v2183_v40, %v1284_v41 }
0x24a9   : > { %1288 = vrot.lane.b32.xlu1 %v1286_v42, %s2266_s8 }
0x251b   : > { %v1289_v43 = vpop.permute.xlu1 %1288 }
0x251c   : > { %v1291_v44 = vadd.f32 %v1289_v43, %v1229_v33 }
0x251e   : > { %2184 = vtanh.f32 %v1291_v44 }
0x2528   : > { %v2185_v45 = vpop.eup %2184 }
0x2529   : > { %v1293_v47 = vsub.f32 %v1217_v25, %v2185_v45 }
0x252b   : > { %1295 = vrot.lane.b32.xlu0 %v1293_v47, %s2268_s10 }
0x259d   : > { %v1296_v48 = vpop.permute.xlu0 %1295 }
0x259e   : > { %v1298_v49 = vmul.f32 %v2183_v40, %v1296_v48 }
0x25a0   : > { %1300 = vrot.lane.b32.xlu1 %v1298_v49, %s2267_s9 }
0x2612   : > { %v1301_v51 = vpop.permute.xlu1 %1300 }
0x2613   : > { %v1303_v52 = vadd.f32 %v2185_v45, %v1301_v51  ;;  %v1869_v51 = vld [vmem:[%s2320_s24 + $0x38] sm:$0xff]  }
0x2615   : > { %v2538_v53 = vpack.c.bf16 %v1303_v52, %v1303_v52 }
0x2617   : > { %1316 = vrot.lane.b32.xlu0 %v2538_v53, %s2266_s8 }
0x2689   : > { %v1317_v54 = vpop.permute.xlu0 %1316 }
0x268a   : > { %2049 = vmatmul.mubr.msk.bf16.vlgmr.msra.gmra.mrb[24].mxu0 %vm281_vm2, %v1317_v54 }
0x268b   : > { %2061 = vmatpush3.bf16.msra.mxu0 %v2334_v1  ;;  %2064 = vmatprep.mubr.msk.bf16.mxu0 %vm2265_vm1, %v2264_v2 }
0x268c   : > { %2062 = vmatprep.subr.bf16.mxu0 %v2264_v2 }
0x268f   : > { %2063 = vmatpush3.bf16.msra.mxu0 %v2342_v3 }
0x275d   : > { %v1355_v55 = vpop.f32.mrb[24].mxu0 }
0x275e   : > { %1369 = vrot.lane.b32.xlu1 %v1355_v55, %s2266_s8  ;;  %v2050_v56 = vpop.f32.mrb[25].mxu0  ;;  %v1361_v63 = vadd.f32 %v1355_v55, %v1315_v62 }
0x275f   : > { %v1358_v57 = vpop.f32.mrb[26].mxu0 }
0x2760   : > { %v2051_v58 = vpop.f32.mrb[27].mxu0  ;;  %v1861_v0 = vmul.f32 -1.442695, %v1361_v63 }
0x2762   : > { %2186 = vpow2.f32 %v1861_v0 }
0x276c   : > { %v2187_v4 = vpop.eup %2186 }
0x276d   : > { %v1365_v5 = vadd.f32 1.0, %v2187_v4 }
0x276f   : > { %2188 = vrcp.f32 %v1365_v5 }
0x2779   : > { %v2189_v6 = vpop.eup %2188 }
0x27d0   : > { %v1370_v7 = vpop.permute.xlu1 %1369 }
0x27d1   : > { %v1372_v8 = vmul.f32 %v2189_v6, %v1370_v7 }
0x27d3   : > { %1374 = vrot.lane.b32.xlu0 %v1372_v8, %s2266_s8 }
0x2845   : > { %v1375_v10 = vpop.permute.xlu0 %1374 }
0x2846   : > { %v1377_v11 = vadd.f32 %v1375_v10, %v1315_v62 }
0x2848   : > { %2190 = vtanh.f32 %v1377_v11 }
0x2852   : > { %v2191_v13 = vpop.eup %2190 }
0x2853   : > { %v1379_v14 = vsub.f32 %v1303_v52, %v2191_v13  ;;  %v1487_v52 = vunpack.c.l.bf16 %v1869_v51 }
0x2855   : > { %1381 = vrot.lane.b32.xlu1 %v1379_v14, %s2268_s10 }
0x28c7   : > { %v1382_v15 = vpop.permute.xlu1 %1381 }
0x28c8   : > { %v1384_v16 = vmul.f32 %v2189_v6, %v1382_v15 }
0x28ca   : > { %1386 = vrot.lane.b32.xlu0 %v1384_v16, %s2267_s9 }
0x293c   : > { %v1387_v17 = vpop.permute.xlu0 %1386 }
0x293d   : > { %v1389_v18 = vadd.f32 %v2191_v13, %v1387_v17 }
0x293f   : > { %v2553_v19 = vpack.c.bf16 %v1389_v18, %v1389_v18 }
0x2941   : > { %1402 = vrot.lane.b32.xlu1 %v2553_v19, %s2266_s8 }
0x29b3   : > { %v1403_v20 = vpop.permute.xlu1 %1402 }
0x29b4   : > { %2057 = vmatmul.mubr.msk.bf16.vlgmr.msra.gmra.mrb[24].mxu1 %vm281_vm2, %v1403_v20 }
0x29b5   : > { %2069 = vmatpush3.bf16.msra.mxu1 %v2334_v1  ;;  %2072 = vmatprep.mubr.msk.bf16.mxu1 %vm2265_vm1, %v2264_v2 }
0x29b6   : > { %2070 = vmatprep.subr.bf16.mxu1 %v2264_v2 }
0x29b9   : > { %2071 = vmatpush3.bf16.msra.mxu1 %v2342_v3 }
0x2a87   : > { %v1441_v22 = vpop.f32.mrb[24].mxu1 }
0x2a88   : > { %1455 = vrot.lane.b32.xlu0 %v1441_v22, %s2266_s8  ;;  %v2058_v23 = vpop.f32.mrb[25].mxu1  ;;  %v1447_v29 = vadd.f32 %v1441_v22, %v1401_v27 }
0x2a89   : > { %v1444_v24 = vpop.f32.mrb[26].mxu1 }
0x2a8a   : > { %v2059_v25 = vpop.f32.mrb[27].mxu1  ;;  %v1866_v30 = vmul.f32 -1.442695, %v1447_v29 }
0x2a8c   : > { %2192 = vpow2.f32 %v1866_v30 }
0x2a96   : > { %v2193_v31 = vpop.eup %2192 }
0x2a97   : > { %v1451_v32 = vadd.f32 1.0, %v2193_v31 }
0x2a99   : > { %2194 = vrcp.f32 %v1451_v32 }
0x2aa3   : > { %v2195_v1 = vpop.eup %2194 }
0x2afa   : > { %v1456_v33 = vpop.permute.xlu0 %1455 }
0x2afb   : > { %v1458_v34 = vmul.f32 %v2195_v1, %v1456_v33 }
0x2afd   : > { %1460 = vrot.lane.b32.xlu1 %v1458_v34, %s2266_s8 }
0x2b6f   : > { %v1461_v2 = vpop.permute.xlu1 %1460 }
0x2b70   : > { %v1463_v3 = vadd.f32 %v1461_v2, %v1401_v27 }
0x2b72   : > { %2196 = vtanh.f32 %v1463_v3 }
0x2b7c   : > { %v2197_v37 = vpop.eup %2196 }
0x2b7d   : > { %v1465_v38 = vsub.f32 %v1389_v18, %v2197_v37  ;;  %v1573_v18 = vunpack.c.h.bf16 %v1869_v51 }
0x2b7f   : > { %1467 = vrot.lane.b32.xlu0 %v1465_v38, %s2268_s10 }
0x2bf1   : > { %v1468_v39 = vpop.permute.xlu0 %1467 }
0x2bf2   : > { %v1470_v40 = vmul.f32 %v2195_v1, %v1468_v39 }
0x2bf4   : > { %1472 = vrot.lane.b32.xlu1 %v1470_v40, %s2267_s9 }
0x2c66   : > { %v1473_v41 = vpop.permute.xlu1 %1472 }
0x2c67   : > { %v1475_v42 = vadd.f32 %v2197_v37, %v1473_v41 }
0x2c69   : > { %v2567_v43 = vpack.c.bf16 %v1475_v42, %v1475_v42 }
0x2c6b   : > { %1488 = vrot.lane.b32.xlu0 %v2567_v43, %s2266_s8 }
0x2cdd   : > { %v1489_v44 = vpop.permute.xlu0 %1488 }
0x2cde   : > { %2065 = vmatmul.mubr.msk.bf16.vlgmr.msra.gmra.mrb[28].mxu0 %vm281_vm2, %v1489_v44 }
0x2db1   : > { %v1527_v45 = vpop.f32.mrb[28].mxu0 }
0x2db2   : > { %1541 = vrot.lane.b32.xlu1 %v1527_v45, %s2266_s8  ;;  %v2066_v47 = vpop.f32.mrb[29].mxu0  ;;  %v1533_v54 = vadd.f32 %v1527_v45, %v1487_v52 }
0x2db3   : > { %v1530_v48 = vpop.f32.mrb[30].mxu0 }
0x2db4   : > { %v2067_v49 = vpop.f32.mrb[31].mxu0  ;;  %v1871_v55 = vmul.f32 -1.442695, %v1533_v54 }
0x2db6   : > { %2198 = vpow2.f32 %v1871_v55 }
0x2dc0   : > { %v2199_v56 = vpop.eup %2198 }
0x2dc1   : > { %v1537_v57 = vadd.f32 1.0, %v2199_v56 }
0x2dc3   : > { %2200 = vrcp.f32 %v1537_v57 }
0x2dcd   : > { %v2201_v58 = vpop.eup %2200 }
0x2e24   : > { %v1542_v60 = vpop.permute.xlu1 %1541 }
0x2e25   : > { %v1544_v62 = vmul.f32 %v2201_v58, %v1542_v60 }
0x2e27   : > { %1546 = vrot.lane.b32.xlu0 %v1544_v62, %s2266_s8 }
0x2e99   : > { %v1547_v63 = vpop.permute.xlu0 %1546 }
0x2e9a   : > { %v1549_v0 = vadd.f32 %v1547_v63, %v1487_v52 }
0x2e9c   : > { %2202 = vtanh.f32 %v1549_v0 }
0x2ea6   : > { %v2203_v4 = vpop.eup %2202 }
0x2ea7   : > { %v1551_v5 = vsub.f32 %v1475_v42, %v2203_v4 }
0x2ea9   : > { %1553 = vrot.lane.b32.xlu1 %v1551_v5, %s2268_s10 }
0x2f1b   : > { %v1554_v6 = vpop.permute.xlu1 %1553 }
0x2f1c   : > { %v1556_v7 = vmul.f32 %v2201_v58, %v1554_v6 }
0x2f1e   : > { %1558 = vrot.lane.b32.xlu0 %v1556_v7, %s2267_s9 }
0x2f90   : > { %v1559_v8 = vpop.permute.xlu0 %1558 }
0x2f91   : > { %v1561_v10 = vadd.f32 %v2203_v4, %v1559_v8 }
0x2f93   : > { %v1562_v11 = vpack.c.bf16 %v1561_v10, %v1561_v10 }
0x2f95   : > { %1574 = vrot.lane.b32.xlu1 %v1562_v11, %s2266_s8 }
0x3007   : > { %v1575_v13 = vpop.permute.xlu1 %1574 }
0x3008   : > { %2073 = vmatmul.mubr.msk.bf16.vlgmr.msra.gmra.mrb[28].mxu1 %vm281_vm2, %v1575_v13 }
0x30db   : > { %v1613_v14 = vpop.f32.mrb[28].mxu1 }
0x30dc   : > { %1627 = vrot.lane.b32.xlu0 %v1613_v14, %s2266_s8  ;;  %v2074_v15 = vpop.f32.mrb[29].mxu1  ;;  %v1619_v20 = vadd.f32 %v1613_v14, %v1573_v18 }
0x30dd   : > { %v1616_v16 = vpop.f32.mrb[30].mxu1 }
0x30de   : > { %v2075_v17 = vpop.f32.mrb[31].mxu1  ;;  %v1876_v22 = vmul.f32 -1.442695, %v1619_v20 }
0x30e0   : > { %2204 = vpow2.f32 %v1876_v22 }
0x30ea   : > { %v2205_v23 = vpop.eup %2204 }
0x30eb   : > { %v1623_v24 = vadd.f32 1.0, %v2205_v23 }
0x30ed   : > { %2206 = vrcp.f32 %v1623_v24 }
0x30f7   : > { %v2207_v25 = vpop.eup %2206 }
0x314e   : > { %v1628_v27 = vpop.permute.xlu0 %1627 }
0x314f   : > { %v1630_v29 = vmul.f32 %v2207_v25, %v1628_v27 }
0x3151   : > { %1632 = vrot.lane.b32.xlu1 %v1630_v29, %s2266_s8 }
0x31c3   : > { %v1633_v30 = vpop.permute.xlu1 %1632 }
0x31c4   : > { %v1635_v31 = vadd.f32 %v1633_v30, %v1573_v18 }
0x31c6   : > { %2208 = vtanh.f32 %v1635_v31 }
0x31d0   : > { %v2209_v32 = vpop.eup %2208 }
0x31d1   : > { %v1637_v1 = vsub.f32 %v1561_v10, %v2209_v32 }
0x31d3   : > { %1639 = vrot.lane.b32.xlu0 %v1637_v1, %s2268_s10 }
0x31d7   : > { %362 = vrot.lane.b32.xlu0 %v2368_v28, %s2266_s8 }
0x31db   : > { %534 = vrot.lane.b32.xlu0 %v2399_v12, %s2266_s8 }
0x31df   : > { %706 = vrot.lane.b32.xlu0 %v2430_v59, %s2266_s8 }
0x31e3   : > { %878 = vrot.lane.b32.xlu0 %v2461_v46, %s2266_s8 }
0x31e7   : > { %1050 = vrot.lane.b32.xlu0 %v2492_v36, %s2266_s8 }
0x31eb   : > { %1222 = vrot.lane.b32.xlu0 %v2523_v26, %s2266_s8 }
0x31ef   : > { %1394 = vrot.lane.b32.xlu0 %v2553_v19, %s2266_s8 }
0x31f3   : > { %1566 = vrot.lane.b32.xlu0 %v1562_v11, %s2266_s8 }
0x3245   : > { %v1640_v28 = vpop.permute.xlu0 %1639 }
0x3246   : > { %v1642_v12 = vmul.f32 %v2207_v25, %v1640_v28 }
0x3248   : > { %1644 = vrot.lane.b32.xlu1 %v1642_v12, %s2267_s9 }
0x3249   : > { %v363_v59 = vpop.permute.xlu0 %362 }
0x324a   : > { %366 = vst.msk [vmem:[%s2325_s27] sm:$0xf] %vm365_vm3, %v363_v59 }
0x324c   : > { %448 = vrot.lane.b32.xlu1 %v2383_v50, %s2266_s8 }
0x324d   : > { %v535_v46 = vpop.permute.xlu0 %534 }
0x324e   : > { %1813 = vst.msk [vmem:[%s2325_s27 + $0x8] sm:$0xf] %vm365_vm3, %v535_v46 }
0x3250   : > { %620 = vrot.lane.b32.xlu1 %v2414_v35, %s2266_s8 }
0x3251   : > { %v707_v36 = vpop.permute.xlu0 %706 }
0x3252   : > { %1823 = vst.msk [vmem:[%s2325_s27 + $0x10] sm:$0xf] %vm365_vm3, %v707_v36 }
0x3254   : > { %792 = vrot.lane.b32.xlu1 %v2445_v21, %s2266_s8 }
0x3255   : > { %v879_v26 = vpop.permute.xlu0 %878 }
0x3256   : > { %1833 = vst.msk [vmem:[%s2325_s27 + $0x18] sm:$0xf] %vm365_vm3, %v879_v26 }
0x3258   : > { %964 = vrot.lane.b32.xlu1 %v2476_v9, %s2266_s8 }
0x3259   : > { %v1051_v50 = vpop.permute.xlu0 %1050 }
0x325a   : > { %1843 = vst.msk [vmem:[%s2325_s27 + $0x20] sm:$0xf] %vm365_vm3, %v1051_v50 }
0x325c   : > { %1136 = vrot.lane.b32.xlu1 %v2507_v61, %s2266_s8 }
0x325d   : > { %v1223_v35 = vpop.permute.xlu0 %1222 }
0x325e   : > { %1853 = vst.msk [vmem:[%s2325_s27 + $0x28] sm:$0xf] %vm365_vm3, %v1223_v35 }
0x3260   : > { %1308 = vrot.lane.b32.xlu1 %v2538_v53, %s2266_s8 }
0x3261   : > { %v1395_v21 = vpop.permute.xlu0 %1394 }
0x3262   : > { %1863 = vst.msk [vmem:[%s2325_s27 + $0x30] sm:$0xf] %vm365_vm3, %v1395_v21 }
0x3264   : > { %1480 = vrot.lane.b32.xlu1 %v2567_v43, %s2266_s8 }
0x3265   : > { %v1567_v9 = vpop.permute.xlu0 %1566 }
0x3266   : > { %1873 = vst.msk [vmem:[%s2325_s27 + $0x38] sm:$0xf] %vm365_vm3, %v1567_v9 }
0x32ba   : > { %v1645_v61 = vpop.permute.xlu1 %1644 }
0x32bb   : > { %v1647_v19 = vadd.f32 %v2209_v32, %v1645_v61 }
0x32bd   : > { %v1899_v33 = vpack.c.bf16 %v1647_v19, %v1647_v19  ;;  %1658 = vrot.lane.b32.xlu0 %v1647_v19, %s2266_s8 }
0x32be   : > { %v449_v53 = vpop.permute.xlu1 %448 }
0x32bf   : > { %1808 = vst.msk [vmem:[%s2325_s27 + $0x4] sm:$0xf] %vm365_vm3, %v449_v53  ;;  %1652 = vrot.lane.b32.xlu1 %v1899_v33, %s2266_s8 }
0x32c2   : > { %v621_v34 = vpop.permute.xlu1 %620 }
0x32c3   : > { %1818 = vst.msk [vmem:[%s2325_s27 + $0xc] sm:$0xf] %vm365_vm3, %v621_v34 }
0x32c6   : > { %v793_v2 = vpop.permute.xlu1 %792 }
0x32c7   : > { %1828 = vst.msk [vmem:[%s2325_s27 + $0x14] sm:$0xf] %vm365_vm3, %v793_v2 }
0x32ca   : > { %v965_v3 = vpop.permute.xlu1 %964 }
0x32cb   : > { %1838 = vst.msk [vmem:[%s2325_s27 + $0x1c] sm:$0xf] %vm365_vm3, %v965_v3 }
0x32ce   : > { %v1137_v37 = vpop.permute.xlu1 %1136 }
0x32cf   : > { %1848 = vst.msk [vmem:[%s2325_s27 + $0x24] sm:$0xf] %vm365_vm3, %v1137_v37 }
0x32d2   : > { %v1309_v38 = vpop.permute.xlu1 %1308 }
0x32d3   : > { %1858 = vst.msk [vmem:[%s2325_s27 + $0x2c] sm:$0xf] %vm365_vm3, %v1309_v38 }
0x32d6   : > { %v1481_v39 = vpop.permute.xlu1 %1480 }
0x32d7   : > { %1868 = vst.msk [vmem:[%s2325_s27 + $0x34] sm:$0xf] %vm365_vm3, %v1481_v39 }
0x332c   : > { %1665 = sbr.rel (%p1879_p6) target bundleno = 13107 (0x3333), region = 40 }
0x332f   : > { %v1659_v40 = vpop.permute.xlu0 %1658 }
0x3330   : > { %1661 = vst.msk [vmem:[#allocation2] sm:$0xff] %vm281_vm2, %v1659_v40  ;;  %1666 = vst.msk [vmem:[#allocation3] sm:$0xff] (!%p1879_p6), %vm281_vm2, %v1659_v40 }
0x3331   : > { %v1653_v41 = vpop.permute.xlu1 %1652 }
0x3332   : > { %1878 = vst.msk [vmem:[%s2325_s27 + $0x3c] sm:$0xf] %vm365_vm3, %v1653_v41 }
0x3333 PF: > { %p2651_p7 = scmp.eq.s32.totalorder %s1788_s18, 1  ;;  %s2269_s12 = smov [#allocation3]  }
0x3334   : > { %s1688_s13 = sshll.u32 %s2269_s12, 4  ;;  %s1689_s13 = int_to_ptr.vmem [resolvable:$true] %s1688_s13 }
0x3335   : > { %s2210_s14 = scalar_lea.vmem %s1689_s13, 128  ;;  %p2217_p11 = scmp.lt.s32.totalorder %s1689_s13, %s1689_s13 }
0x3336   : > { %p2211_p8 = scmp.ne.s32.totalorder %s1689_s13, %s2210_s14  ;;  %p2218_p12 = scmp.lt.s32.totalorder %s2210_s14, %s2210_s14 }
0x3338   : > { %p2212_p9 = pnand %p2211_p8, %p2651_p7  ;;  %p2219_p13 = por %p2218_p12, %p2217_p11 }
0x333a   : > { %p2213_p10 = pneg %p2212_p9 }
0x333c   : > { %p2220_p0 = pnand %p2219_p13, %p2213_p10 }
0x333e   : > { %2223 = shalt.err (!%p2220_p0)
}
0x333f   : > { %s2224_s18 = scalar_lea.hbm %s2690_s4, 128 }
0x3340   : > { %p2225_p1 = scmp.ne.s32.totalorder %s2690_s4, %s2224_s18  ;;  %p2230_p4 = scmp.lt.u32.totalorder %s2224_s18, %s2690_s4 }
0x3342   : > { %p2226_p2 = pnand %p2225_p1, %p2651_p7 }
0x3344   : > { %p2227_p3 = pneg %p2226_p2 }
0x3346   : > { %p2232_p5 = pnand %p2230_p4, %p2227_p3 }
0x3348   : > { %2235 = shalt.err (!%p2232_p5)
}
0x3349   : > { %2077 = dma.vmem_to_hbm [thread:$0]  (%p2651_p7), %s1689_s13, 128, %s2690_s4, [#allocation4]  }
0x334a   : > { %2249 = dma.done.wait (%p2651_p7), [#allocation4], 128  }
0x334b   : > { %2251 = vsyncadd (%p2651_p7), [#allocation4], 4294967168 }
0x334c PF: > { %s16_s17 = sadd.s32 1, %s2262_s17   ;;  %s2692_s15 = smov %s2258_s16 }
0x334d   : > { %p13_p6 = scmp.ge.s32.totalorder %s16_s17, 4   ;;  %s2693_s16 = smov %s2695_s19 }
0x334f   :  { %15 = sbr.rel (!%p13_p6) target bundleno = 2 (0x2), region = 113 }
0x3356   :  { %1712 = vsyncpa [#allocation4], 1 }
0x3357   :  { %1714 = vsyncpa [#allocation4 + $0x1], 1 }

</bundles_post_ra>
